<compile_context>
chip_gen: v7x
topology: tpu7x:2x2x1
jax: 0.10.0
libtpu: 0.0.40
codegen_flags: <defaults>
</compile_context>

<pallas_src>
import functools

import jax
import jax.numpy as jnp
from jax.experimental import pallas as pl
from jax.experimental.pallas import tpu as pltpu

EPS = 1e-5  # nn.LayerNorm default eps


def _layernorm(x, g, b):
    mu = jnp.mean(x, axis=-1, keepdims=True)
    var = jnp.mean(jnp.square(x - mu), axis=-1, keepdims=True)
    return (x - mu) * jax.lax.rsqrt(var + EPS) * g + b


def block_kernel(x_ref,
                 ln1_g_ref, ln1_b_ref,
                 w1_ref, b1_ref, w2_ref, b2_ref,
                 ln2_g_ref, ln2_b_ref,
                 wf1_ref, bf1_ref, wf2_ref, bf2_ref,
                 o_ref, *, num_head):
    """One grid step = a block of `Nb` batch elements; all of S and E in VMEM."""
    Nb, S, E = x_ref.shape
    H = num_head
    d = E // H
    R = Nb * S

    # Load LN params / biases once (f32).  Weights stay as bf16 refs.
    g1, be1 = ln1_g_ref[...], ln1_b_ref[...]
    g2, be2 = ln2_g_ref[...], ln2_b_ref[...]
    b1v, b2v = b1_ref[...], b2_ref[...]
    bf1v, bf2v = bf1_ref[...], bf2_ref[...]

    # Merge (Nb, S) -> rows; leading-dim merge is layout-free.
    x = x_ref[...].astype(jnp.float32).reshape(R, E)

    # ---------------- ln_1 (f32 elementwise) ----------------
    h = _layernorm(x, g1, be1)

    # ---------------- self-attention ----------------
    # QKV projection: (R, E) @ (E, 3E) on the MXU, bf16 inputs, f32 accumulation.
    # The 1/sqrt(d) scale is already folded into the Q columns of w1/b1.
    qkv = jnp.dot(h.astype(jnp.bfloat16), w1_ref[...],
                  preferred_element_type=jnp.float32) + b1v            # (R, 3E) f32
    # w1 was repacked in the wrapper to [Q heads | K heads | V heads], each
    # head a contiguous d-wide stripe, so per-head slices below are aligned.
    qkv = qkv.reshape(Nb, S, 3 * E).astype(jnp.bfloat16)

    attn = jnp.zeros((R, E), jnp.float32)
    for hh in range(H):                      # static loop, H is small
        lo = hh * d
        q = qkv[:, :, lo:lo + d]                          # (Nb, S, d)
        k = qkv[:, :, E + lo:E + lo + d]                  # (Nb, S, d)
        v = qkv[:, :, 2 * E + lo:2 * E + lo + d]          # (Nb, S, d)
        # Batched matmul contracting the last dims -> no explicit k.T.
        sc = jnp.einsum("nqd,nkd->nqk", q, k,
                        preferred_element_type=jnp.float32)            # (Nb, S, S) f32
        sc = sc - jnp.max(sc, axis=-1, keepdims=True)
        p = jnp.exp(sc)
        p = p * pl.reciprocal(jnp.sum(p, axis=-1, keepdims=True), approx=True)
        # TODO(synk): dropout1 (p=0.1) is identity in eval mode.
        ctx = jnp.einsum("nqk,nkd->nqd", p.astype(jnp.bfloat16), v,
                         preferred_element_type=jnp.float32)           # (Nb, S, d) f32
        # Fused head-concat + linear2: project this head's context with its
        # (d, E) slab of w2 and accumulate in f32 (no scratch, no masked
        # sub-lane-width stores).
        attn = attn + jnp.dot(ctx.reshape(R, d).astype(jnp.bfloat16), w2_ref[hh],
                              preferred_element_type=jnp.float32)      # (R, E) f32
    attn = attn + b2v
    # dropout2 (p=0.1) is identity in eval mode.

    # ---------------- residual + ln_2 (f32) ----------------
    y = _layernorm(attn + x, g2, be2)

    # ---------------- feed-forward ----------------
    f = jnp.dot(y.astype(jnp.bfloat16), wf1_ref[...],
                preferred_element_type=jnp.float32) + bf1v             # (R, 6E)
    f = jnp.maximum(f, 0.0)
    f = jnp.dot(f.astype(jnp.bfloat16), wf2_ref[...],
                preferred_element_type=jnp.float32) + bf2v             # (R, E)
    # TODO(synk): outer dropout (p=0.1) is identity in eval mode.

    o_ref[...] = (f + y).reshape(Nb, S, E).astype(o_ref.dtype)


def _repack_qkv(w1, b1, num_head):
    """Permute linear1 output columns from per-head-interleaved [q|k|v] stripes
    to [all-Q heads | all-K heads | all-V heads] and fold the 1/sqrt(d)
    attention scale into the Q columns (all zero runtime cost)."""
    E = w1.shape[0]
    d = E // num_head
    scale = 1.0 / (float(d) ** 0.5)
    qkv_scale = jnp.array([scale, 1.0, 1.0], jnp.float32).reshape(1, 1, 3, 1)
    w = w1.reshape(E, num_head, 3, d) * qkv_scale
    b = b1.reshape(1, num_head, 3, d) * qkv_scale
    w = jnp.transpose(w, (0, 2, 1, 3)).reshape(E, 3 * E)
    b = jnp.transpose(b, (0, 2, 1, 3)).reshape(1, 3 * E)
    return w, b


def _repack_w2(w2, num_head):
    """Split linear2 input rows (head-major) into per-head (d, E) slabs."""
    E = w2.shape[0]
    d = E // num_head
    return w2.reshape(num_head, d, E)


def _pick_batch_block(n, s, target_rows=256):
    """Largest divisor of n whose row count (nb*s) is ~target_rows; prefer a
    grid of >=2 steps (v7x megacore) when that keeps >=128 rows per matmul."""
    divisors = [i for i in range(1, n + 1) if n % i == 0]
    cap = max(1, target_rows // max(s, 1))
    fitting = [i for i in divisors if i <= cap]
    nb = max(fitting) if fitting else 1
    if n > 1 and n // nb == 1:
        smaller = [i for i in divisors if i < nb and i * s >= 128]
        if smaller:
            nb = max(smaller)
    return nb


def _vmem_limit_bytes(nb, s, e, h):
    bf16, f32 = 2, 4
    w = bf16 * (3 * e * e + e * e + 6 * e * e + 6 * e * e) + f32 * 15 * e
    blocks = 2 * 2 * f32 * nb * s * e                 # x + out blocks, double-buffered
    inter = f32 * nb * s * (3 * e + 6 * e + 6 * e)    # qkv, FF hidden, attn acc, misc
    inter += f32 * nb * h * s * s * 2                 # score/prob tiles (loose bound)
    est = 2 * w + blocks + inter                      # weights double-buffered worst case
    return int(min(64 * 1024 * 1024, max(32 * 1024 * 1024, 2 * est)))


def block_forward(x, params, num_head):
    """x: (N, S, E) float32. params: dict of weights (see init_params)."""
    N, S, E = x.shape
    assert E % num_head == 0
    Nb = _pick_batch_block(N, S)
    grid = (N // Nb,)

    w1p, b1p = _repack_qkv(params["w1"], params["b1"], num_head)
    w2p = _repack_w2(params["w2"], num_head)

    weights = (
        params["ln1_g"].astype(jnp.float32), params["ln1_b"].astype(jnp.float32),
        w1p.astype(jnp.bfloat16), b1p.astype(jnp.float32),
        w2p.astype(jnp.bfloat16), params["b2"].astype(jnp.float32),
        params["ln2_g"].astype(jnp.float32), params["ln2_b"].astype(jnp.float32),
        params["wf1"].astype(jnp.bfloat16), params["bf1"].astype(jnp.float32),
        params["wf2"].astype(jnp.bfloat16), params["bf2"].astype(jnp.float32),
    )

    def full_spec(shape):
        zeros = (0,) * len(shape)
        return pl.BlockSpec(shape, lambda n, _z=zeros: _z)

    in_specs = [pl.BlockSpec((Nb, S, E), lambda n: (n, 0, 0))]
    in_specs += [full_spec(w.shape) for w in weights]

    kernel = functools.partial(block_kernel, num_head=num_head)
    return pl.pallas_call(
        kernel,
        out_shape=jax.ShapeDtypeStruct((N, S, E), x.dtype),
        grid=grid,
        in_specs=in_specs,
        out_specs=pl.BlockSpec((Nb, S, E), lambda n: (n, 0, 0)),
        compiler_params=pltpu.CompilerParams(
            dimension_semantics=("parallel",),
            vmem_limit_bytes=_vmem_limit_bytes(Nb, S, E, num_head),
        ),
    )(x, *weights)


def init_params(key, embed_dim):
    """Deterministic synthetic parameters (shapes follow the nn.Module __init__),
    stored in the PyTorch column layout and f32; repack/cast happen in the wrapper."""
    E = embed_dim
    ks = jax.random.split(key, 6)
    s = 0.05
    return {
        "ln1_g": jnp.ones((1, E), jnp.float32),
        "ln1_b": jnp.zeros((1, E), jnp.float32),
        "ln2_g": jnp.ones((1, E), jnp.float32),
        "ln2_b": jnp.zeros((1, E), jnp.float32),
        # attention.linear1: (E -> 3E), stored transposed (in, out)
        "w1": s * jax.random.normal(ks[0], (E, 3 * E), jnp.float32),
        "b1": s * jax.random.normal(ks[1], (1, 3 * E), jnp.float32),
        # attention.linear2: (E -> E)
        "w2": s * jax.random.normal(ks[2], (E, E), jnp.float32),
        "b2": s * jax.random.normal(ks[3], (1, E), jnp.float32),
        # feed_forward: Linear(E, 6E), ReLU, Linear(6E, E)
        "wf1": s * jax.random.normal(ks[4], (E, 6 * E), jnp.float32),
        "bf1": jnp.zeros((1, 6 * E), jnp.float32),
        "wf2": s * jax.random.normal(ks[5], (6 * E, E), jnp.float32),
        "bf2": jnp.zeros((1, E), jnp.float32),
    }


def block_reference(x, p, num_head):
    """Pure-JAX f32 reference mirroring the PyTorch forward (eval mode)."""
    N, S, E = x.shape
    d = E // num_head

    def ln(v, g, b):
        mu = v.mean(-1, keepdims=True)
        var = ((v - mu) ** 2).mean(-1, keepdims=True)
        return (v - mu) / jnp.sqrt(var + EPS) * g + b

    h = ln(x, p["ln1_g"], p["ln1_b"])
    qkv = h @ p["w1"] + p["b1"]                                   # (N, S, 3E)
    qkv = qkv.reshape(N, S, num_head, 3 * d).transpose(0, 2, 1, 3)
    q, k, v = jnp.split(qkv, 3, axis=-1)
    w = jnp.einsum("nhqd,nhkd->nhqk", q, k) / (d ** 0.5)
    w = jax.nn.softmax(w, axis=-1)
    a = jnp.einsum("nhqk,nhkd->nhqd", w, v).transpose(0, 2, 1, 3).reshape(N, S, E)
    a = a @ p["w2"] + p["b2"]
    y = ln(a + x, p["ln2_g"], p["ln2_b"])
    f = jnp.maximum(y @ p["wf1"] + p["bf1"], 0.0) @ p["wf2"] + p["bf2"]
    return f + y


if __name__ == "__main__":
    N, S, E, H = 2, 8, 32, 4
    key = jax.random.PRNGKey(0)
    kx, kp = jax.random.split(key)
    x = jax.random.normal(kx, (N, S, E), jnp.float32)
    params = init_params(kp, E)

    fwd = jax.jit(functools.partial(block_forward, num_head=H))
    out = jax.block_until_ready(fwd(x, params))

    ref = block_reference(x, params, num_head=H)
    assert out.shape == (N, S, E)
    # bf16 matmuls + approx reciprocal => relax tolerance vs the f32 reference.
    max_err = float(jnp.max(jnp.abs(out - ref)))
    assert max_err < 5e-2, f"max abs err {max_err}"

    print("KERNEL_OK")
</pallas_src>

<mosaic_0001>
module attributes {stable_mosaic.version = 11 : i64} {
  func.func @block_kernel(%arg0: i32, %arg1: memref<2x8x32xf32, #tpu.memory_space<vmem>>, %arg2: memref<1x32xf32, #tpu.memory_space<vmem>>, %arg3: memref<1x32xf32, #tpu.memory_space<vmem>>, %arg4: memref<32x96xbf16, #tpu.memory_space<vmem>>, %arg5: memref<1x96xf32, #tpu.memory_space<vmem>>, %arg6: memref<4x8x32xbf16, #tpu.memory_space<vmem>>, %arg7: memref<1x32xf32, #tpu.memory_space<vmem>>, %arg8: memref<1x32xf32, #tpu.memory_space<vmem>>, %arg9: memref<1x32xf32, #tpu.memory_space<vmem>>, %arg10: memref<32x192xbf16, #tpu.memory_space<vmem>>, %arg11: memref<1x192xf32, #tpu.memory_space<vmem>>, %arg12: memref<192x32xbf16, #tpu.memory_space<vmem>>, %arg13: memref<1x32xf32, #tpu.memory_space<vmem>>, %arg14: memref<2x8x32xf32, #tpu.memory_space<vmem>>) attributes {dimension_semantics = [#tpu.dimension_semantics<parallel>], iteration_bounds = array<i64: 1>, scalar_prefetch = 0 : i64, scratch_operands = 0 : i64, tpu.core_type = #tpu.core_type<tc>, window_params = [{transform_indices = @transform_0, window_bounds = array<i64: 2, 8, 32>}, {pipeline_mode = #tpu.pipeline_mode<synchronous>, transform_indices = @transform_1, window_bounds = array<i64: 1, 32>}, {pipeline_mode = #tpu.pipeline_mode<synchronous>, transform_indices = @transform_2, window_bounds = array<i64: 1, 32>}, {pipeline_mode = #tpu.pipeline_mode<synchronous>, transform_indices = @transform_3, window_bounds = array<i64: 32, 96>}, {pipeline_mode = #tpu.pipeline_mode<synchronous>, transform_indices = @transform_4, window_bounds = array<i64: 1, 96>}, {pipeline_mode = #tpu.pipeline_mode<synchronous>, transform_indices = @transform_5, window_bounds = array<i64: 4, 8, 32>}, {pipeline_mode = #tpu.pipeline_mode<synchronous>, transform_indices = @transform_6, window_bounds = array<i64: 1, 32>}, {pipeline_mode = #tpu.pipeline_mode<synchronous>, transform_indices = @transform_7, window_bounds = array<i64: 1, 32>}, {pipeline_mode = #tpu.pipeline_mode<synchronous>, transform_indices = @transform_8, window_bounds = array<i64: 1, 32>}, {pipeline_mode = #tpu.pipeline_mode<synchronous>, transform_indices = @transform_9, window_bounds = array<i64: 32, 192>}, {pipeline_mode = #tpu.pipeline_mode<synchronous>, transform_indices = @transform_10, window_bounds = array<i64: 1, 192>}, {pipeline_mode = #tpu.pipeline_mode<synchronous>, transform_indices = @transform_11, window_bounds = array<i64: 192, 32>}, {pipeline_mode = #tpu.pipeline_mode<synchronous>, transform_indices = @transform_12, window_bounds = array<i64: 1, 32>}, {transform_indices = @transform_13, window_bounds = array<i64: 2, 8, 32>}]} {
    %c0 = arith.constant 0 : index
    %c0_0 = arith.constant 0 : index
    %0 = vector.load %arg2[%c0, %c0_0] : memref<1x32xf32, #tpu.memory_space<vmem>>, vector<1x32xf32>
    %c0_1 = arith.constant 0 : index
    %c0_2 = arith.constant 0 : index
    %1 = vector.load %arg3[%c0_1, %c0_2] : memref<1x32xf32, #tpu.memory_space<vmem>>, vector<1x32xf32>
    %c0_3 = arith.constant 0 : index
    %c0_4 = arith.constant 0 : index
    %2 = vector.load %arg8[%c0_3, %c0_4] : memref<1x32xf32, #tpu.memory_space<vmem>>, vector<1x32xf32>
    %c0_5 = arith.constant 0 : index
    %c0_6 = arith.constant 0 : index
    %3 = vector.load %arg9[%c0_5, %c0_6] : memref<1x32xf32, #tpu.memory_space<vmem>>, vector<1x32xf32>
    %c0_7 = arith.constant 0 : index
    %c0_8 = arith.constant 0 : index
    %4 = vector.load %arg5[%c0_7, %c0_8] : memref<1x96xf32, #tpu.memory_space<vmem>>, vector<1x96xf32>
    %c0_9 = arith.constant 0 : index
    %c0_10 = arith.constant 0 : index
    %5 = vector.load %arg7[%c0_9, %c0_10] : memref<1x32xf32, #tpu.memory_space<vmem>>, vector<1x32xf32>
    %c0_11 = arith.constant 0 : index
    %c0_12 = arith.constant 0 : index
    %6 = vector.load %arg11[%c0_11, %c0_12] : memref<1x192xf32, #tpu.memory_space<vmem>>, vector<1x192xf32>
    %c0_13 = arith.constant 0 : index
    %c0_14 = arith.constant 0 : index
    %7 = vector.load %arg13[%c0_13, %c0_14] : memref<1x32xf32, #tpu.memory_space<vmem>>, vector<1x32xf32>
    %c0_15 = arith.constant 0 : index
    %c0_16 = arith.constant 0 : index
    %c0_17 = arith.constant 0 : index
    %8 = vector.load %arg1[%c0_15, %c0_16, %c0_17] : memref<2x8x32xf32, #tpu.memory_space<vmem>>, vector<2x8x32xf32>
    %9 = vector.shape_cast %8 : vector<2x8x32xf32> to vector<16x32xf32>
    %cst = arith.constant dense<0.000000e+00> : vector<16xf32>
    %10 = vector.multi_reduction <add>, %9, %cst [1] : vector<16x32xf32> to vector<16xf32>
    %11 = vector.shape_cast %10 : vector<16xf32> to vector<16x1xf32>
    %cst_18 = arith.constant 3.200000e+01 : f32
    %12 = vector.broadcast %cst_18 : f32 to vector<16x1xf32>
    %13 = arith.divf %11, %12 : vector<16x1xf32>
    %14 = vector.broadcast %13 : vector<16x1xf32> to vector<16x32xf32>
    %15 = arith.subf %9, %14 : vector<16x32xf32>
    %16 = arith.mulf %15, %15 : vector<16x32xf32>
    %cst_19 = arith.constant dense<0.000000e+00> : vector<16xf32>
    %17 = vector.multi_reduction <add>, %16, %cst_19 [1] : vector<16x32xf32> to vector<16xf32>
    %18 = vector.shape_cast %17 : vector<16xf32> to vector<16x1xf32>
    %cst_20 = arith.constant 3.200000e+01 : f32
    %19 = vector.broadcast %cst_20 : f32 to vector<16x1xf32>
    %20 = arith.divf %18, %19 : vector<16x1xf32>
    %21 = vector.broadcast %13 : vector<16x1xf32> to vector<16x32xf32>
    %22 = arith.subf %9, %21 : vector<16x32xf32>
    %cst_21 = arith.constant 9.99999974E-6 : f32
    %23 = vector.broadcast %cst_21 : f32 to vector<16x1xf32>
    %24 = arith.addf %20, %23 : vector<16x1xf32>
    %25 = math.rsqrt %24 : vector<16x1xf32>
    %26 = vector.broadcast %25 : vector<16x1xf32> to vector<16x32xf32>
    %27 = arith.mulf %22, %26 : vector<16x32xf32>
    %28 = vector.broadcast %0 : vector<1x32xf32> to vector<16x32xf32>
    %29 = arith.mulf %27, %28 : vector<16x32xf32>
    %30 = vector.broadcast %1 : vector<1x32xf32> to vector<16x32xf32>
    %31 = arith.addf %29, %30 : vector<16x32xf32>
    %32 = arith.truncf %31 : vector<16x32xf32> to vector<16x32xbf16>
    %c0_22 = arith.constant 0 : index
    %c0_23 = arith.constant 0 : index
    %33 = vector.load %arg4[%c0_22, %c0_23] : memref<32x96xbf16, #tpu.memory_space<vmem>>, vector<32x96xbf16>
    %cst_24 = arith.constant dense<0.000000e+00> : vector<16x96xf32>
    %34 = tpu.matmul %32, %33, %cst_24 {dimension_numbers = #tpu.dot_dimension_numbers<[1], [0], [0], [1], [0, 0, 1, 1], [], []>} : vector<16x32xbf16>, vector<32x96xbf16>, vector<16x96xf32> -> vector<16x96xf32>
    %35 = vector.broadcast %4 : vector<1x96xf32> to vector<16x96xf32>
    %36 = arith.addf %34, %35 : vector<16x96xf32>
    %37 = vector.shape_cast %36 : vector<16x96xf32> to vector<2x8x96xf32>
    %38 = arith.truncf %37 : vector<2x8x96xf32> to vector<2x8x96xbf16>
    %cst_25 = arith.constant 0.000000e+00 : f32
    %39 = vector.broadcast %cst_25 : f32 to vector<16x32xf32>
    %40 = vector.extract_strided_slice %38 {offsets = [0, 0, 0], sizes = [2, 8, 8], strides = [1, 1, 1]} : vector<2x8x96xbf16> to vector<2x8x8xbf16>
    %41 = vector.extract_strided_slice %38 {offsets = [0, 0, 32], sizes = [2, 8, 8], strides = [1, 1, 1]} : vector<2x8x96xbf16> to vector<2x8x8xbf16>
    %42 = vector.extract_strided_slice %38 {offsets = [0, 0, 64], sizes = [2, 8, 8], strides = [1, 1, 1]} : vector<2x8x96xbf16> to vector<2x8x8xbf16>
    "tpu.trace_start"() <{level = 10 : i32, message = "nqd,nkd->nqk"}> : () -> ()
    %cst_26 = arith.constant dense<0.000000e+00> : vector<2x8x8xf32>
    %43 = tpu.matmul %40, %41, %cst_26 {dimension_numbers = #tpu.dot_dimension_numbers<[2], [2], [1], [1], [0, 0, 0, 1, 1, 1], [0], [0]>} : vector<2x8x8xbf16>, vector<2x8x8xbf16>, vector<2x8x8xf32> -> vector<2x8x8xf32>
    "tpu.trace_stop"() : () -> ()
    %cst_27 = arith.constant dense<0xFF800000> : vector<2x8xf32>
    %44 = vector.multi_reduction <maximumf>, %43, %cst_27 [2] : vector<2x8x8xf32> to vector<2x8xf32>
    %45 = vector.shape_cast %44 : vector<2x8xf32> to vector<2x8x1xf32>
    %46 = vector.broadcast %45 : vector<2x8x1xf32> to vector<2x8x8xf32>
    %47 = arith.subf %43, %46 : vector<2x8x8xf32>
    %48 = math.exp %47 : vector<2x8x8xf32>
    %cst_28 = arith.constant dense<0.000000e+00> : vector<2x8xf32>
    %49 = vector.multi_reduction <add>, %48, %cst_28 [2] : vector<2x8x8xf32> to vector<2x8xf32>
    %50 = vector.shape_cast %49 : vector<2x8xf32> to vector<2x8x1xf32>
    %51 = tpu.reciprocal %50 {approx = true} : vector<2x8x1xf32> -> vector<2x8x1xf32>
    %52 = vector.broadcast %51 : vector<2x8x1xf32> to vector<2x8x8xf32>
    %53 = arith.mulf %48, %52 : vector<2x8x8xf32>
    %54 = arith.truncf %53 : vector<2x8x8xf32> to vector<2x8x8xbf16>
    "tpu.trace_start"() <{level = 10 : i32, message = "nqk,nkd->nqd"}> : () -> ()
    %cst_29 = arith.constant dense<0.000000e+00> : vector<2x8x8xf32>
    %55 = tpu.matmul %54, %42, %cst_29 {dimension_numbers = #tpu.dot_dimension_numbers<[2], [1], [1], [2], [0, 0, 0, 1, 1, 2], [0], [0]>} : vector<2x8x8xbf16>, vector<2x8x8xbf16>, vector<2x8x8xf32> -> vector<2x8x8xf32>
    "tpu.trace_stop"() : () -> ()
    %56 = vector.shape_cast %55 : vector<2x8x8xf32> to vector<16x8xf32>
    %57 = arith.truncf %56 : vector<16x8xf32> to vector<16x8xbf16>
    %c0_30 = arith.constant 0 : index
    %c0_31 = arith.constant 0 : index
    %c0_32 = arith.constant 0 : index
    %58 = vector.load %arg6[%c0_30, %c0_31, %c0_32] : memref<4x8x32xbf16, #tpu.memory_space<vmem>>, vector<1x8x32xbf16>
    %59 = vector.shape_cast %58 : vector<1x8x32xbf16> to vector<8x32xbf16>
    %cst_33 = arith.constant dense<0.000000e+00> : vector<16x32xf32>
    %60 = tpu.matmul %57, %59, %cst_33 {dimension_numbers = #tpu.dot_dimension_numbers<[1], [0], [0], [1], [0, 0, 1, 1], [], []>} : vector<16x8xbf16>, vector<8x32xbf16>, vector<16x32xf32> -> vector<16x32xf32>
    %61 = arith.addf %39, %60 : vector<16x32xf32>
    %62 = vector.extract_strided_slice %38 {offsets = [0, 0, 8], sizes = [2, 8, 8], strides = [1, 1, 1]} : vector<2x8x96xbf16> to vector<2x8x8xbf16>
    %63 = vector.extract_strided_slice %38 {offsets = [0, 0, 40], sizes = [2, 8, 8], strides = [1, 1, 1]} : vector<2x8x96xbf16> to vector<2x8x8xbf16>
    %64 = vector.extract_strided_slice %38 {offsets = [0, 0, 72], sizes = [2, 8, 8], strides = [1, 1, 1]} : vector<2x8x96xbf16> to vector<2x8x8xbf16>
    "tpu.trace_start"() <{level = 10 : i32, message = "nqd,nkd->nqk"}> : () -> ()
    %cst_34 = arith.constant dense<0.000000e+00> : vector<2x8x8xf32>
    %65 = tpu.matmul %62, %63, %cst_34 {dimension_numbers = #tpu.dot_dimension_numbers<[2], [2], [1], [1], [0, 0, 0, 1, 1, 1], [0], [0]>} : vector<2x8x8xbf16>, vector<2x8x8xbf16>, vector<2x8x8xf32> -> vector<2x8x8xf32>
    "tpu.trace_stop"() : () -> ()
    %cst_35 = arith.constant dense<0xFF800000> : vector<2x8xf32>
    %66 = vector.multi_reduction <maximumf>, %65, %cst_35 [2] : vector<2x8x8xf32> to vector<2x8xf32>
    %67 = vector.shape_cast %66 : vector<2x8xf32> to vector<2x8x1xf32>
    %68 = vector.broadcast %67 : vector<2x8x1xf32> to vector<2x8x8xf32>
    %69 = arith.subf %65, %68 : vector<2x8x8xf32>
    %70 = math.exp %69 : vector<2x8x8xf32>
    %cst_36 = arith.constant dense<0.000000e+00> : vector<2x8xf32>
    %71 = vector.multi_reduction <add>, %70, %cst_36 [2] : vector<2x8x8xf32> to vector<2x8xf32>
    %72 = vector.shape_cast %71 : vector<2x8xf32> to vector<2x8x1xf32>
    %73 = tpu.reciprocal %72 {approx = true} : vector<2x8x1xf32> -> vector<2x8x1xf32>
    %74 = vector.broadcast %73 : vector<2x8x1xf32> to vector<2x8x8xf32>
    %75 = arith.mulf %70, %74 : vector<2x8x8xf32>
    %76 = arith.truncf %75 : vector<2x8x8xf32> to vector<2x8x8xbf16>
    "tpu.trace_start"() <{level = 10 : i32, message = "nqk,nkd->nqd"}> : () -> ()
    %cst_37 = arith.constant dense<0.000000e+00> : vector<2x8x8xf32>
    %77 = tpu.matmul %76, %64, %cst_37 {dimension_numbers = #tpu.dot_dimension_numbers<[2], [1], [1], [2], [0, 0, 0, 1, 1, 2], [0], [0]>} : vector<2x8x8xbf16>, vector<2x8x8xbf16>, vector<2x8x8xf32> -> vector<2x8x8xf32>
    "tpu.trace_stop"() : () -> ()
    %78 = vector.shape_cast %77 : vector<2x8x8xf32> to vector<16x8xf32>
    %79 = arith.truncf %78 : vector<16x8xf32> to vector<16x8xbf16>
    %c1 = arith.constant 1 : index
    %c0_38 = arith.constant 0 : index
    %c0_39 = arith.constant 0 : index
    %80 = vector.load %arg6[%c1, %c0_38, %c0_39] : memref<4x8x32xbf16, #tpu.memory_space<vmem>>, vector<1x8x32xbf16>
    %81 = vector.shape_cast %80 : vector<1x8x32xbf16> to vector<8x32xbf16>
    %cst_40 = arith.constant dense<0.000000e+00> : vector<16x32xf32>
    %82 = tpu.matmul %79, %81, %cst_40 {dimension_numbers = #tpu.dot_dimension_numbers<[1], [0], [0], [1], [0, 0, 1, 1], [], []>} : vector<16x8xbf16>, vector<8x32xbf16>, vector<16x32xf32> -> vector<16x32xf32>
    %83 = arith.addf %61, %82 : vector<16x32xf32>
    %84 = vector.extract_strided_slice %38 {offsets = [0, 0, 16], sizes = [2, 8, 8], strides = [1, 1, 1]} : vector<2x8x96xbf16> to vector<2x8x8xbf16>
    %85 = vector.extract_strided_slice %38 {offsets = [0, 0, 48], sizes = [2, 8, 8], strides = [1, 1, 1]} : vector<2x8x96xbf16> to vector<2x8x8xbf16>
    %86 = vector.extract_strided_slice %38 {offsets = [0, 0, 80], sizes = [2, 8, 8], strides = [1, 1, 1]} : vector<2x8x96xbf16> to vector<2x8x8xbf16>
    "tpu.trace_start"() <{level = 10 : i32, message = "nqd,nkd->nqk"}> : () -> ()
    %cst_41 = arith.constant dense<0.000000e+00> : vector<2x8x8xf32>
    %87 = tpu.matmul %84, %85, %cst_41 {dimension_numbers = #tpu.dot_dimension_numbers<[2], [2], [1], [1], [0, 0, 0, 1, 1, 1], [0], [0]>} : vector<2x8x8xbf16>, vector<2x8x8xbf16>, vector<2x8x8xf32> -> vector<2x8x8xf32>
    "tpu.trace_stop"() : () -> ()
    %cst_42 = arith.constant dense<0xFF800000> : vector<2x8xf32>
    %88 = vector.multi_reduction <maximumf>, %87, %cst_42 [2] : vector<2x8x8xf32> to vector<2x8xf32>
    %89 = vector.shape_cast %88 : vector<2x8xf32> to vector<2x8x1xf32>
    %90 = vector.broadcast %89 : vector<2x8x1xf32> to vector<2x8x8xf32>
    %91 = arith.subf %87, %90 : vector<2x8x8xf32>
    %92 = math.exp %91 : vector<2x8x8xf32>
    %cst_43 = arith.constant dense<0.000000e+00> : vector<2x8xf32>
    %93 = vector.multi_reduction <add>, %92, %cst_43 [2] : vector<2x8x8xf32> to vector<2x8xf32>
    %94 = vector.shape_cast %93 : vector<2x8xf32> to vector<2x8x1xf32>
    %95 = tpu.reciprocal %94 {approx = true} : vector<2x8x1xf32> -> vector<2x8x1xf32>
    %96 = vector.broadcast %95 : vector<2x8x1xf32> to vector<2x8x8xf32>
    %97 = arith.mulf %92, %96 : vector<2x8x8xf32>
    %98 = arith.truncf %97 : vector<2x8x8xf32> to vector<2x8x8xbf16>
    "tpu.trace_start"() <{level = 10 : i32, message = "nqk,nkd->nqd"}> : () -> ()
    %cst_44 = arith.constant dense<0.000000e+00> : vector<2x8x8xf32>
    %99 = tpu.matmul %98, %86, %cst_44 {dimension_numbers = #tpu.dot_dimension_numbers<[2], [1], [1], [2], [0, 0, 0, 1, 1, 2], [0], [0]>} : vector<2x8x8xbf16>, vector<2x8x8xbf16>, vector<2x8x8xf32> -> vector<2x8x8xf32>
    "tpu.trace_stop"() : () -> ()
    %100 = vector.shape_cast %99 : vector<2x8x8xf32> to vector<16x8xf32>
    %101 = arith.truncf %100 : vector<16x8xf32> to vector<16x8xbf16>
    %c2 = arith.constant 2 : index
    %c0_45 = arith.constant 0 : index
    %c0_46 = arith.constant 0 : index
    %102 = vector.load %arg6[%c2, %c0_45, %c0_46] : memref<4x8x32xbf16, #tpu.memory_space<vmem>>, vector<1x8x32xbf16>
    %103 = vector.shape_cast %102 : vector<1x8x32xbf16> to vector<8x32xbf16>
    %cst_47 = arith.constant dense<0.000000e+00> : vector<16x32xf32>
    %104 = tpu.matmul %101, %103, %cst_47 {dimension_numbers = #tpu.dot_dimension_numbers<[1], [0], [0], [1], [0, 0, 1, 1], [], []>} : vector<16x8xbf16>, vector<8x32xbf16>, vector<16x32xf32> -> vector<16x32xf32>
    %105 = arith.addf %83, %104 : vector<16x32xf32>
    %106 = vector.extract_strided_slice %38 {offsets = [0, 0, 24], sizes = [2, 8, 8], strides = [1, 1, 1]} : vector<2x8x96xbf16> to vector<2x8x8xbf16>
    %107 = vector.extract_strided_slice %38 {offsets = [0, 0, 56], sizes = [2, 8, 8], strides = [1, 1, 1]} : vector<2x8x96xbf16> to vector<2x8x8xbf16>
    %108 = vector.extract_strided_slice %38 {offsets = [0, 0, 88], sizes = [2, 8, 8], strides = [1, 1, 1]} : vector<2x8x96xbf16> to vector<2x8x8xbf16>
    "tpu.trace_start"() <{level = 10 : i32, message = "nqd,nkd->nqk"}> : () -> ()
    %cst_48 = arith.constant dense<0.000000e+00> : vector<2x8x8xf32>
    %109 = tpu.matmul %106, %107, %cst_48 {dimension_numbers = #tpu.dot_dimension_numbers<[2], [2], [1], [1], [0, 0, 0, 1, 1, 1], [0], [0]>} : vector<2x8x8xbf16>, vector<2x8x8xbf16>, vector<2x8x8xf32> -> vector<2x8x8xf32>
    "tpu.trace_stop"() : () -> ()
    %cst_49 = arith.constant dense<0xFF800000> : vector<2x8xf32>
    %110 = vector.multi_reduction <maximumf>, %109, %cst_49 [2] : vector<2x8x8xf32> to vector<2x8xf32>
    %111 = vector.shape_cast %110 : vector<2x8xf32> to vector<2x8x1xf32>
    %112 = vector.broadcast %111 : vector<2x8x1xf32> to vector<2x8x8xf32>
    %113 = arith.subf %109, %112 : vector<2x8x8xf32>
    %114 = math.exp %113 : vector<2x8x8xf32>
    %cst_50 = arith.constant dense<0.000000e+00> : vector<2x8xf32>
    %115 = vector.multi_reduction <add>, %114, %cst_50 [2] : vector<2x8x8xf32> to vector<2x8xf32>
    %116 = vector.shape_cast %115 : vector<2x8xf32> to vector<2x8x1xf32>
    %117 = tpu.reciprocal %116 {approx = true} : vector<2x8x1xf32> -> vector<2x8x1xf32>
    %118 = vector.broadcast %117 : vector<2x8x1xf32> to vector<2x8x8xf32>
    %119 = arith.mulf %114, %118 : vector<2x8x8xf32>
    %120 = arith.truncf %119 : vector<2x8x8xf32> to vector<2x8x8xbf16>
    "tpu.trace_start"() <{level = 10 : i32, message = "nqk,nkd->nqd"}> : () -> ()
    %cst_51 = arith.constant dense<0.000000e+00> : vector<2x8x8xf32>
    %121 = tpu.matmul %120, %108, %cst_51 {dimension_numbers = #tpu.dot_dimension_numbers<[2], [1], [1], [2], [0, 0, 0, 1, 1, 2], [0], [0]>} : vector<2x8x8xbf16>, vector<2x8x8xbf16>, vector<2x8x8xf32> -> vector<2x8x8xf32>
    "tpu.trace_stop"() : () -> ()
    %122 = vector.shape_cast %121 : vector<2x8x8xf32> to vector<16x8xf32>
    %123 = arith.truncf %122 : vector<16x8xf32> to vector<16x8xbf16>
    %c3 = arith.constant 3 : index
    %c0_52 = arith.constant 0 : index
    %c0_53 = arith.constant 0 : index
    %124 = vector.load %arg6[%c3, %c0_52, %c0_53] : memref<4x8x32xbf16, #tpu.memory_space<vmem>>, vector<1x8x32xbf16>
    %125 = vector.shape_cast %124 : vector<1x8x32xbf16> to vector<8x32xbf16>
    %cst_54 = arith.constant dense<0.000000e+00> : vector<16x32xf32>
    %126 = tpu.matmul %123, %125, %cst_54 {dimension_numbers = #tpu.dot_dimension_numbers<[1], [0], [0], [1], [0, 0, 1, 1], [], []>} : vector<16x8xbf16>, vector<8x32xbf16>, vector<16x32xf32> -> vector<16x32xf32>
    %127 = arith.addf %105, %126 : vector<16x32xf32>
    %128 = vector.broadcast %5 : vector<1x32xf32> to vector<16x32xf32>
    %129 = arith.addf %127, %128 : vector<16x32xf32>
    %130 = arith.addf %129, %9 : vector<16x32xf32>
    %cst_55 = arith.constant dense<0.000000e+00> : vector<16xf32>
    %131 = vector.multi_reduction <add>, %130, %cst_55 [1] : vector<16x32xf32> to vector<16xf32>
    %132 = vector.shape_cast %131 : vector<16xf32> to vector<16x1xf32>
    %cst_56 = arith.constant 3.200000e+01 : f32
    %133 = vector.broadcast %cst_56 : f32 to vector<16x1xf32>
    %134 = arith.divf %132, %133 : vector<16x1xf32>
    %135 = vector.broadcast %134 : vector<16x1xf32> to vector<16x32xf32>
    %136 = arith.subf %130, %135 : vector<16x32xf32>
    %137 = arith.mulf %136, %136 : vector<16x32xf32>
    %cst_57 = arith.constant dense<0.000000e+00> : vector<16xf32>
    %138 = vector.multi_reduction <add>, %137, %cst_57 [1] : vector<16x32xf32> to vector<16xf32>
    %139 = vector.shape_cast %138 : vector<16xf32> to vector<16x1xf32>
    %cst_58 = arith.constant 3.200000e+01 : f32
    %140 = vector.broadcast %cst_58 : f32 to vector<16x1xf32>
    %141 = arith.divf %139, %140 : vector<16x1xf32>
    %142 = vector.broadcast %134 : vector<16x1xf32> to vector<16x32xf32>
    %143 = arith.subf %130, %142 : vector<16x32xf32>
    %cst_59 = arith.constant 9.99999974E-6 : f32
    %144 = vector.broadcast %cst_59 : f32 to vector<16x1xf32>
    %145 = arith.addf %141, %144 : vector<16x1xf32>
    %146 = math.rsqrt %145 : vector<16x1xf32>
    %147 = vector.broadcast %146 : vector<16x1xf32> to vector<16x32xf32>
    %148 = arith.mulf %143, %147 : vector<16x32xf32>
    %149 = vector.broadcast %2 : vector<1x32xf32> to vector<16x32xf32>
    %150 = arith.mulf %148, %149 : vector<16x32xf32>
    %151 = vector.broadcast %3 : vector<1x32xf32> to vector<16x32xf32>
    %152 = arith.addf %150, %151 : vector<16x32xf32>
    %153 = arith.truncf %152 : vector<16x32xf32> to vector<16x32xbf16>
    %c0_60 = arith.constant 0 : index
    %c0_61 = arith.constant 0 : index
    %154 = vector.load %arg10[%c0_60, %c0_61] : memref<32x192xbf16, #tpu.memory_space<vmem>>, vector<32x192xbf16>
    %cst_62 = arith.constant dense<0.000000e+00> : vector<16x192xf32>
    %155 = tpu.matmul %153, %154, %cst_62 {dimension_numbers = #tpu.dot_dimension_numbers<[1], [0], [0], [1], [0, 0, 1, 1], [], []>} : vector<16x32xbf16>, vector<32x192xbf16>, vector<16x192xf32> -> vector<16x192xf32>
    %156 = vector.broadcast %6 : vector<1x192xf32> to vector<16x192xf32>
    %157 = arith.addf %155, %156 : vector<16x192xf32>
    %cst_63 = arith.constant 0.000000e+00 : f32
    %158 = vector.broadcast %cst_63 : f32 to vector<16x192xf32>
    %159 = arith.maximumf %157, %158 : vector<16x192xf32>
    %160 = arith.truncf %159 : vector<16x192xf32> to vector<16x192xbf16>
    %c0_64 = arith.constant 0 : index
    %c0_65 = arith.constant 0 : index
    %161 = vector.load %arg12[%c0_64, %c0_65] : memref<192x32xbf16, #tpu.memory_space<vmem>>, vector<192x32xbf16>
    %cst_66 = arith.constant dense<0.000000e+00> : vector<16x32xf32>
    %162 = tpu.matmul %160, %161, %cst_66 {dimension_numbers = #tpu.dot_dimension_numbers<[1], [0], [0], [1], [0, 0, 1, 1], [], []>} : vector<16x192xbf16>, vector<192x32xbf16>, vector<16x32xf32> -> vector<16x32xf32>
    %163 = vector.broadcast %7 : vector<1x32xf32> to vector<16x32xf32>
    %164 = arith.addf %162, %163 : vector<16x32xf32>
    %165 = arith.addf %164, %152 : vector<16x32xf32>
    %166 = vector.shape_cast %165 : vector<16x32xf32> to vector<2x8x32xf32>
    %c0_67 = arith.constant 0 : index
    %c0_68 = arith.constant 0 : index
    %c0_69 = arith.constant 0 : index
    %167 = vector.load %arg14[%c0_67, %c0_68, %c0_69] : memref<2x8x32xf32, #tpu.memory_space<vmem>>, vector<2x8x32xf32>
    tpu.vector_store %arg14[%c0_67, %c0_68, %c0_69], %166 {strides = array<i32>} : memref<2x8x32xf32, #tpu.memory_space<vmem>>, vector<2x8x32xf32>,
    return
  }
  func.func @transform_0(%arg0: i32) -> (i32, i32, i32) {
    %c0_i32 = arith.constant 0 : i32
    %c0_i32_0 = arith.constant 0 : i32
    %c0_i32_1 = arith.constant 0 : i32
    return %arg0, %c0_i32, %c0_i32_0 : i32, i32, i32
  }
  func.func @transform_1(%arg0: i32) -> (i32, i32) {
    %c0_i32 = arith.constant 0 : i32
    %c0_i32_0 = arith.constant 0 : i32
    %c0_i32_1 = arith.constant 0 : i32
    return %c0_i32, %c0_i32_0 : i32, i32
  }
  func.func @transform_2(%arg0: i32) -> (i32, i32) {
    %c0_i32 = arith.constant 0 : i32
    %c0_i32_0 = arith.constant 0 : i32
    %c0_i32_1 = arith.constant 0 : i32
    return %c0_i32, %c0_i32_0 : i32, i32
  }
  func.func @transform_3(%arg0: i32) -> (i32, i32) {
    %c0_i32 = arith.constant 0 : i32
    %c0_i32_0 = arith.constant 0 : i32
    %c0_i32_1 = arith.constant 0 : i32
    return %c0_i32, %c0_i32_0 : i32, i32
  }
  func.func @transform_4(%arg0: i32) -> (i32, i32) {
    %c0_i32 = arith.constant 0 : i32
    %c0_i32_0 = arith.constant 0 : i32
    %c0_i32_1 = arith.constant 0 : i32
    return %c0_i32, %c0_i32_0 : i32, i32
  }
  func.func @transform_5(%arg0: i32) -> (i32, i32, i32) {
    %c0_i32 = arith.constant 0 : i32
    %c0_i32_0 = arith.constant 0 : i32
    %c0_i32_1 = arith.constant 0 : i32
    %c0_i32_2 = arith.constant 0 : i32
    return %c0_i32, %c0_i32_0, %c0_i32_1 : i32, i32, i32
  }
  func.func @transform_6(%arg0: i32) -> (i32, i32) {
    %c0_i32 = arith.constant 0 : i32
    %c0_i32_0 = arith.constant 0 : i32
    %c0_i32_1 = arith.constant 0 : i32
    return %c0_i32, %c0_i32_0 : i32, i32
  }
  func.func @transform_7(%arg0: i32) -> (i32, i32) {
    %c0_i32 = arith.constant 0 : i32
    %c0_i32_0 = arith.constant 0 : i32
    %c0_i32_1 = arith.constant 0 : i32
    return %c0_i32, %c0_i32_0 : i32, i32
  }
  func.func @transform_8(%arg0: i32) -> (i32, i32) {
    %c0_i32 = arith.constant 0 : i32
    %c0_i32_0 = arith.constant 0 : i32
    %c0_i32_1 = arith.constant 0 : i32
    return %c0_i32, %c0_i32_0 : i32, i32
  }
  func.func @transform_9(%arg0: i32) -> (i32, i32) {
    %c0_i32 = arith.constant 0 : i32
    %c0_i32_0 = arith.constant 0 : i32
    %c0_i32_1 = arith.constant 0 : i32
    return %c0_i32, %c0_i32_0 : i32, i32
  }
  func.func @transform_10(%arg0: i32) -> (i32, i32) {
    %c0_i32 = arith.constant 0 : i32
    %c0_i32_0 = arith.constant 0 : i32
    %c0_i32_1 = arith.constant 0 : i32
    return %c0_i32, %c0_i32_0 : i32, i32
  }
  func.func @transform_11(%arg0: i32) -> (i32, i32) {
    %c0_i32 = arith.constant 0 : i32
    %c0_i32_0 = arith.constant 0 : i32
    %c0_i32_1 = arith.constant 0 : i32
    return %c0_i32, %c0_i32_0 : i32, i32
  }
  func.func @transform_12(%arg0: i32) -> (i32, i32) {
    %c0_i32 = arith.constant 0 : i32
    %c0_i32_0 = arith.constant 0 : i32
    %c0_i32_1 = arith.constant 0 : i32
    return %c0_i32, %c0_i32_0 : i32, i32
  }
  func.func @transform_13(%arg0: i32) -> (i32, i32, i32) {
    %c0_i32 = arith.constant 0 : i32
    %c0_i32_0 = arith.constant 0 : i32
    %c0_i32_1 = arith.constant 0 : i32
    return %arg0, %c0_i32, %c0_i32_0 : i32, i32, i32
  }
}

</mosaic_0001>

<bundles_post_ra>
// kernel: block_forward.1
= control target key start
LH: loop header
LB: loop body
LE: loop exit
PB: predicated region body
PF: predicated region fallthrough
CT: control target
= control target key end

     0   :  { %vm56_vm0 = vcmask 261120   ;;  %s2260_s0 = inlined_call_operand.vmem [shape: f32[2,8,32], index: 0, kind: input, shape index: {}]   ;;  %s2261_s1 = inlined_call_operand.vmem [shape: f32[1,32], index: 1, kind: input, shape index: {}]   ;;  %s2262_s2 = inlined_call_operand.vmem [shape: f32[1,32], index: 2, kind: input, shape index: {}]   ;;  %s2263_s3 = inlined_call_operand.vmem [shape: bf16[32,96], index: 3, kind: input, shape index: {}]   ;;  %s2264_s4 = inlined_call_operand.vmem [shape: f32[1,96], index: 4, kind: input, shape index: {}]   ;;  %s2265_s5 = inlined_call_operand.vmem [shape: bf16[4,8,32], index: 5, kind: input, shape index: {}]   ;;  %s2266_s6 = inlined_call_operand.vmem [shape: f32[1,32], index: 6, kind: input, shape index: {}]   ;;  %s2267_s7 = inlined_call_operand.vmem [shape: f32[1,32], index: 7, kind: input, shape index: {}]   ;;  %s2268_s8 = inlined_call_operand.vmem [shape: f32[1,32], index: 8, kind: input, shape index: {}]   ;;  %s2269_s9 = inlined_call_operand.vmem [shape: bf16[32,192], index: 9, kind: input, shape index: {}]   ;;  %s2270_s10 = inlined_call_operand.vmem [shape: f32[1,192], index: 10, kind: input, shape index: {}]   ;;  %s2271_s11 = inlined_call_operand.vmem [shape: bf16[192,32], index: 11, kind: input, shape index: {}]   ;;  %s2272_s12 = inlined_call_operand.vmem [shape: f32[1,32], index: 12, kind: input, shape index: {}]   ;;  %s2273_s13 = inlined_call_operand.hbm [shape: f32[2,8,32], index: 13, kind: output, shape index: {}]  }
   0x1   :  { %v1972_v0 = vld [vmem:[%s2260_s0] sm:$0xff]  ;;  %v1977_v1 = vld [vmem:[%s2260_s0 + $0x8] sm:$0xff] }
   0x2   :  { %v57_v2 = vsel %vm56_vm0, %v1972_v0, 0.0  ;;  %v60_v3 = vsel %vm56_vm0, %v1977_v1, 0.0 }
   0x3   :  { %58 = vadd.xlane.f32.xlu0 %v57_v2 }
   0x7   :  { %61 = vadd.xlane.f32.xlu0 %v60_v3 }
   0x8   :  { %18 = vsyncpa [#allocation3], 0  ;;  %v1798_v14 = vld [vmem:[%s2263_s3] sm:$0xff]   ;;  %v1882_v15 = vmov 0.0   ;;  %v1799_v16 = vld [vmem:[%s2263_s3 + $0x8] sm:$0xff]   ;;  %vm1883_vm1 = vmmov 0  }
   0x9   :  { %1653 = vmatprep.subr.bf16.mxu1 %v1882_v15  ;;  %1691 = vmatprep.subr.bf16.mxu0 %v1882_v15  ;;  %v1559_v25 = vld [vmem:[%s2261_s1] ss:$0 sm:$0xff]  ;;  %s1884_s1 = smov 96   ;;  %vm172_vm2 = vcmask 64512   ;;  %s1887_s20 = smov 120   ;;  %vm297_vm3 = vcmask 1043456  }
   0xa   :  { %1654 = vmatpush3.bf16.msra.mxu1 %v1798_v14  ;;  %1657 = vmatprep.mubr.msk.bf16.mxu1 %vm1883_vm1, %v1882_v15  ;;  %v1560_v29 = vld [vmem:[%s2262_s2] ss:$0 sm:$0xff]  ;;  %s1885_s2 = smov 64   ;;  %s1888_s21 = smov 56   ;;  %vm1494_vm4 = vcmask 523264  }
   0xb   :  { %1655 = vmatprep.subr.bf16.mxu1 %v1882_v15  ;;  %1693 = vmatprep.mubr.msk.bf16.mxu0 %vm1883_vm1, %v1882_v15  ;;  %v1561_v34 = vld [vmem:[%s2264_s4] ss:$0 sm:$0xff]  ;;  %s1886_s4 = smov 88   ;;  %s1889_s22 = smov 80  }
   0xc   :  { %s1890_s23 = smov 112   ;;  %s1891_s28 = smov 48  }
   0xd   :  { %s1892_s0 = smov 72   ;;  %s1893_s29 = smov 104  }
   0xe   :  { %1656 = vmatpush3.bf16.msra.mxu1 %v1799_v16  ;;  %s1894_s3 = smov 40   ;;  %s1896_s25 = smov [#allocation2]  }
   0xf   :  { %1661 = vmatprep.subr.bf16.mxu1 %v1882_v15  ;;  %s1548_s26 = sshll.u32 %s1896_s25, 4  ;;  %s1549_s26 = int_to_ptr.vmem [resolvable:$true] %s1548_s26 }
  0x10   :  { %s1858_s27 = scalar_lea.vmem %s1549_s26, 256  ;;  %p1863_p1 = scmp.lt.s32.totalorder %s1549_s26, %s1549_s26 }
  0x11   :  { %p1859_p0 = scmp.ne.s32.totalorder %s1549_s26, %s1858_s27  ;;  %p1864_p2 = scmp.lt.s32.totalorder %s1858_s27, %s1858_s27 }
  0x13   :  { %p1865_p3 = por %p1864_p2, %p1863_p1 }
  0x15   :  { %p1866_p4 = pnand %p1865_p3, %p1859_p0 }
  0x90   :  { %v59_v4 = vpop.xlane.xlu0 %58 }
  0x91   :  { %v64_v5 = vmul.f32 0.03125, %v59_v4 }
  0x93   :  { %v66_v6 = vsub.f32 %v1972_v0, %v64_v5 }
  0x94   :  { %v62_v7 = vpop.xlane.xlu0 %61 }
  0x95   :  { %v65_v8 = vmul.f32 0.03125, %v62_v7  ;;  %v68_v9 = vmul.f32 %v66_v6, %v66_v6 }
  0x97   :  { %v67_v10 = vsub.f32 %v1977_v1, %v65_v8  ;;  %v70_v11 = vsel %vm56_vm0, %v68_v9, 0.0 }
  0x98   :  { %71 = vadd.xlane.f32.xlu1 %v70_v11 }
  0x99   :  { %v69_v12 = vmul.f32 %v67_v10, %v67_v10 }
  0x9b   :  { %v73_v13 = vsel %vm56_vm0, %v69_v12, 0.0 }
  0x9c   :  { %74 = vadd.xlane.f32.xlu1 %v73_v13 }
 0x125   :  { %v72_v17 = vpop.xlane.xlu1 %71 }
 0x126   :  { %v76_v18 = vmul.f32 0.03125, %v72_v17 }
 0x128   :  { %v78_v19 = vadd.f32 1e-05, %v76_v18 }
 0x129   :  { %v75_v20 = vpop.xlane.xlu1 %74 }
 0x12a   :  { %1818 = vrsqrt.f32 %v78_v19  ;;  %v77_v21 = vmul.f32 0.03125, %v75_v20 }
 0x12c   :  { %v79_v22 = vadd.f32 1e-05, %v77_v21 }
 0x12e   :  { %1820 = vrsqrt.f32 %v79_v22 }
 0x134   :  { %v1819_v23 = vpop.eup %1818 }
 0x135   :  { %v82_v24 = vmul.f32 %v1819_v23, %v66_v6 }
 0x137   :  { %v90_v28 = vmul.f32 %v1559_v25, %v82_v24 }
 0x138   :  { %v1821_v26 = vpop.eup %1820 }
 0x139   :  { %v83_v27 = vmul.f32 %v1821_v26, %v67_v10  ;;  %v98_v31 = vadd.f32 %v1560_v29, %v90_v28 }
 0x13b   :  { %v91_v30 = vmul.f32 %v1559_v25, %v83_v27 }
 0x13d   :  { %v99_v32 = vadd.f32 %v1560_v29, %v91_v30 }
 0x13f   :  { %v100_v33 = vpack.c.bf16 %v99_v32, %v98_v31 }
 0x141   :  { %1658 = vmatmul.mubr.msk.bf16.vlgmr.msra.gmra.mrb[0].mxu1 %vm56_vm0, %v100_v33 }
 0x142   :  { %1663 = vmatprep.mubr.msk.bf16.mxu1 %vm1883_vm1, %v1882_v15 }
 0x214   :  { %v160_v35 = vpop.f32.mrb[0].mxu1 }
 0x215   :  { %v161_v36 = vadd.f32 %v1561_v34, %v160_v35  ;;  %v1659_v37 = vpop.f32.mrb[1].mxu1 }
 0x216   :  { %v163_v38 = vpop.f32.mrb[2].mxu1 }
 0x217   :  { %v2013_v39 = vpack.c.bf16 %v161_v36, %v161_v36  ;;  %v164_v40 = vadd.f32 %v1561_v34, %v163_v38  ;;  %v1660_v41 = vpop.f32.mrb[3].mxu1 }
 0x219   :  { %v2015_v42 = vpack.c.bf16 %v164_v40, %v164_v40  ;;  %170 = vrot.lane.b32.xlu0 %v2013_v39, %s1884_s1 }
 0x21b   :  { %220 = vrot.lane.b32.xlu1 %v2015_v42, %s1884_s1 }
 0x28b   :  { %v171_v43 = vpop.permute.xlu0 %170 }
 0x28c   :  { %v177_v44 = vsel %vm172_vm2, %v171_v43, 0 }
 0x28d   :  { %1662 = vmatpush3.bf16.xpose.msra.mxu1 %v177_v44  ;;  %v221_v45 = vpop.permute.xlu1 %220 }
 0x28e   :  { %1667 = vmatprep.subr.bf16.mxu1 %v1882_v15  ;;  %v226_v46 = vsel %vm172_vm2, %v221_v45, 0 }
 0x294   :  { %1664 = vmatmul.mubr.msk.bf16.vlgmr.msra.gmra.mrb[4].mxu1 %vm172_vm2, %v2013_v39 }
 0x295   :  { %1668 = vmatpush3.bf16.xpose.msra.mxu1 %v226_v46  ;;  %1669 = vmatprep.mubr.msk.bf16.mxu1 %vm1883_vm1, %v1882_v15 }
 0x296   :  { %1673 = vmatprep.subr.bf16.mxu1 %v1882_v15 }
 0x29c   :  { %1670 = vmatmul.mubr.msk.bf16.vlgmr.msra.gmra.mrb[8].mxu1 %vm172_vm2, %v2015_v42 }
 0x29d   :  { %1675 = vmatprep.mubr.msk.bf16.mxu1 %vm1883_vm1, %v1882_v15 }
 0x367   :  { %v213_v47 = vpop.f32.mrb[4].mxu1 }
 0x368   :  { %v1665_v48 = vpop.f32.mrb[5].mxu1  ;;  %v268_v49 = vsel %vm172_vm2, %v213_v47, -inf }
 0x369   :  { %269 = vmax.xlane.f32.xlu1 %v268_v49  ;;  %v216_v50 = vpop.f32.mrb[6].mxu1 }
 0x36a   :  { %v1666_v51 = vpop.f32.mrb[7].mxu1 }
 0x36f   :  { %v262_v52 = vpop.f32.mrb[8].mxu1 }
 0x370   :  { %v1671_v53 = vpop.f32.mrb[9].mxu1  ;;  %v271_v54 = vsel %vm172_vm2, %v262_v52, -inf }
 0x371   :  { %272 = vmax.xlane.f32.xlu0 %v271_v54  ;;  %v265_v55 = vpop.f32.mrb[10].mxu1 }
 0x372   :  { %v1672_v56 = vpop.f32.mrb[11].mxu1 }
 0x37a   :  { %341 = vrot.lane.b32.xlu1 %v2015_v42, %s1885_s2 }
 0x37e   :  { %393 = vrot.lane.b32.xlu1 %v2013_v39, %s1886_s4 }
 0x3f6   :  { %v270_v57 = vpop.xlane.xlu1 %269 }
 0x3f7   :  { %v274_v58 = vsub.f32 %v213_v47, %v270_v57 }
 0x3f9   :  { %v276_v59 = vmul.f32 1.442695, %v274_v58 }
 0x3fa   :  { %v342_v5 = vpop.permute.xlu1 %341 }
 0x3fb   :  { %1822 = vpow2.f32 %v276_v59  ;;  %v347_v17 = vsel %vm297_vm3, %v342_v5, 0  ;;  %v390_v59 = vld [vmem:[%s2265_s5] sm:$0xf] }
 0x3fe   :  { %v273_v60 = vpop.xlane.xlu0 %272  ;;  %v394_v7 = vpop.permute.xlu1 %393 }
 0x3ff   :  { %v275_v61 = vsub.f32 %v262_v52, %v273_v60  ;;  %v399_v22 = vsel %vm172_vm2, %v394_v7, 0 }
 0x401   :  { %v278_v62 = vmul.f32 1.442695, %v275_v61 }
 0x403   :  { %1824 = vpow2.f32 %v278_v62 }
 0x405   :  { %v1823_v63 = vpop.eup %1822 }
 0x406   :  { %v280_v2 = vsel %vm172_vm2, %v1823_v63, 0.0 }
 0x407   :  { %281 = vadd.xlane.f32.xlu0 %v280_v2 }
 0x40d   :  { %v1825_v3 = vpop.eup %1824 }
 0x40e   :  { %v283_v4 = vsel %vm172_vm2, %v1825_v3, 0.0 }
 0x40f   :  { %284 = vadd.xlane.f32.xlu1 %v283_v4 }
 0x41d   :  { %292 = vrot.lane.b32.xlu0 %v2013_v39, %s1885_s2 }
 0x420   :  { %443 = vrot.lane.b32.xlu1 %v2015_v42, %s1886_s4 }
 0x421   :  { %391 = vrot.lane.b32.xlu0 %v2013_v39, %s1887_s20 }
 0x424   :  { %441 = vrot.lane.b32.xlu1 %v2015_v42, %s1887_s20 }
 0x494   :  { %v282_v6 = vpop.xlane.xlu0 %281 }
 0x495   :  { %1826 = vrcp.f32 %v282_v6 }
 0x498   :  { %v293_v8 = vpop.permute.xlu0 %292 }
 0x499   :  { %v299_v9 = vsel %vm297_vm3, %v293_v8, 0 }
 0x49a   :  { %1674 = vmatpush3.bf16.msra.mxu1 %v299_v9 }
 0x49b   :  { %1679 = vmatprep.subr.bf16.mxu1 %v1882_v15 }
 0x49c   :  { %v285_v10 = vpop.xlane.xlu1 %284  ;;  %v392_v23 = vpop.permute.xlu0 %391 }
 0x49d   :  { %1828 = vrcp.f32 %v285_v10 }
 0x49f   :  { %v1827_v11 = vpop.eup %1826 }
 0x4a0   :  { %v288_v12 = vmul.f32 %v1827_v11, %v1823_v63  ;;  %v444_v13 = vpop.permute.xlu1 %443  ;;  %v665_v63 = vsel %vm297_vm3, %v390_v59, 0  ;;  %v1573_v11 = vld [vmem:[%s2265_s5 + $0x4] sm:$0xf] }
 0x4a1   :  { %v449_v14 = vsel %vm172_vm2, %v444_v13, 0 }
 0x4a2   :  { %1692 = vmatpush3.bf16.xpose.msra.mxu0 %v449_v14  ;;  %v290_v16 = vpack.c.bf16 %v288_v12, %v288_v12  ;;  %v618_v12 = vsel %vm297_vm3, %v1573_v11, 0 }
 0x4a3   :  { %1703 = vmatprep.subr.bf16.mxu0 %v1882_v15 }
 0x4a4   :  { %1676 = vmatmul.mubr.msk.bf16.vlgmr.msra.gmra.mrb[12].mxu1 %vm172_vm2, %v290_v16  ;;  %v442_v20 = vpop.permute.xlu1 %441 }
 0x4a5   :  { %1680 = vmatpush3.bf16.msra.mxu1 %v347_v17  ;;  %1681 = vmatprep.mubr.msk.bf16.mxu1 %vm1883_vm1, %v1882_v15 }
 0x4a6   :  { %1685 = vmatprep.subr.bf16.mxu1 %v1882_v15 }
 0x4a7   :  { %v1829_v18 = vpop.eup %1828 }
 0x4a8   :  { %v289_v19 = vmul.f32 %v1829_v18, %v1825_v3 }
 0x4a9   :  { %1694 = vmatmul.mubr.msk.bf16.vlgmr.msra.gmra.mrb[0].mxu0 %vm172_vm2, %v442_v20 }
 0x4aa   :  { %v291_v21 = vpack.c.bf16 %v289_v19, %v289_v19  ;;  %1705 = vmatprep.mubr.msk.bf16.mxu0 %vm1883_vm1, %v1882_v15 }
 0x4ac   :  { %1682 = vmatmul.mubr.msk.bf16.vlgmr.msra.gmra.mrb[16].mxu1 %vm172_vm2, %v291_v21 }
 0x4ad   :  { %1687 = vmatprep.mubr.msk.bf16.mxu1 %vm1883_vm1, %v1882_v15 }
 0x4ae   :  { %1686 = vmatpush3.bf16.xpose.msra.mxu1 %v399_v22 }
 0x4af   :  { %1697 = vmatprep.subr.bf16.mxu1 %v1882_v15 }
 0x4b5   :  { %1688 = vmatmul.mubr.msk.bf16.vlgmr.msra.gmra.mrb[20].mxu1 %vm172_vm2, %v392_v23 }
 0x4b6   :  { %1699 = vmatprep.mubr.msk.bf16.mxu1 %vm1883_vm1, %v1882_v15 }
 0x577   :  { %v2061_v24 = vpop.f32.mrb[12].mxu1 }
 0x578   :  { %v1677_v25 = vpop.f32.mrb[13].mxu1 }
 0x579   :  { %v338_v26 = vpop.f32.mrb[14].mxu1 }
 0x57a   :  { %v1678_v27 = vpop.f32.mrb[15].mxu1 }
 0x57c   :  { %v485_v28 = vpop.f32.mrb[0].mxu0 }
 0x57d   :  { %v1695_v29 = vpop.f32.mrb[1].mxu0  ;;  %v494_v30 = vsel %vm172_vm2, %v485_v28, -inf }
 0x57e   :  { %495 = vmax.xlane.f32.xlu1 %v494_v30  ;;  %v488_v31 = vpop.f32.mrb[2].mxu0 }
 0x57f   :  { %v383_v32 = vpop.f32.mrb[16].mxu1  ;;  %v1696_v33 = vpop.f32.mrb[3].mxu0 }
 0x580   :  { %v389_v34 = vpack.c.bf16 %v383_v32, %v2061_v24  ;;  %v1683_v35 = vpop.f32.mrb[17].mxu1 }
 0x581   :  { %v386_v36 = vpop.f32.mrb[18].mxu1 }
 0x582   :  { %v1684_v37 = vpop.f32.mrb[19].mxu1 }
 0x588   :  { %v435_v38 = vpop.f32.mrb[20].mxu1 }
 0x589   :  { %v1689_v40 = vpop.f32.mrb[21].mxu1  ;;  %v491_v41 = vsel %vm172_vm2, %v435_v38, -inf }
 0x58a   :  { %492 = vmax.xlane.f32.xlu0 %v491_v41  ;;  %v438_v43 = vpop.f32.mrb[22].mxu1 }
 0x58b   :  { %v1690_v44 = vpop.f32.mrb[23].mxu1 }
 0x58f   :  { %563 = vrot.lane.b32.xlu1 %v2015_v42, %s1888_s21 }
 0x593   :  { %710 = vrot.lane.b32.xlu1 %v2013_v39, %s1889_s22 }
 0x597   :  { %760 = vrot.lane.b32.xlu1 %v2015_v42, %s1889_s22 }
 0x59b   :  { %758 = vrot.lane.b32.xlu1 %v2015_v42, %s1890_s23 }
 0x60b   :  { %v496_v45 = vpop.xlane.xlu1 %495 }
 0x60c   :  { %v498_v46 = vsub.f32 %v485_v28, %v496_v45 }
 0x60e   :  { %v501_v47 = vmul.f32 1.442695, %v498_v46 }
 0x60f   :  { %v564_v48 = vpop.permute.xlu1 %563 }
 0x610   :  { %1830 = vpow2.f32 %v501_v47  ;;  %v569_v49 = vsel %vm297_vm3, %v564_v48, 0 }
 0x611   :  { %1704 = vmatpush3.bf16.msra.mxu0 %v569_v49 }
 0x612   :  { %1715 = vmatprep.subr.bf16.mxu0 %v1882_v15 }
 0x613   :  { %v711_v2 = vpop.permute.xlu1 %710 }
 0x614   :  { %v716_v26 = vsel %vm172_vm2, %v711_v2, 0 }
 0x617   :  { %v493_v50 = vpop.xlane.xlu0 %492  ;;  %v761_v5 = vpop.permute.xlu1 %760 }
 0x618   :  { %v497_v51 = vsub.f32 %v435_v38, %v493_v50  ;;  %v766_v8 = vsel %vm172_vm2, %v761_v5, 0 }
 0x61a   :  { %v1831_v52 = vpop.eup %1830  ;;  %v499_v53 = vmul.f32 1.442695, %v497_v51 }
 0x61b   :  { %v506_v54 = vsel %vm172_vm2, %v1831_v52, 0.0  ;;  %v759_v10 = vpop.permute.xlu1 %758 }
 0x61c   :  { %1832 = vpow2.f32 %v499_v53  ;;  %507 = vadd.xlane.f32.xlu0 %v506_v54 }
 0x626   :  { %v1833_v55 = vpop.eup %1832 }
 0x627   :  { %v503_v56 = vsel %vm172_vm2, %v1833_v55, 0.0 }
 0x628   :  { %504 = vadd.xlane.f32.xlu0 %v503_v56 }
 0x63e   :  { %515 = vrot.lane.b32.xlu0 %v2013_v39, %s1888_s21 }
 0x642   :  { %708 = vrot.lane.b32.xlu0 %v2013_v39, %s1890_s23 }
 0x6a9   :  { %v508_v57 = vpop.xlane.xlu0 %507 }
 0x6aa   :  { %1834 = vrcp.f32 %v508_v57 }
 0x6b4   :  { %v1835_v58 = vpop.eup %1834 }
 0x6b5   :  { %v512_v60 = vmul.f32 %v1835_v58, %v1831_v52  ;;  %v505_v61 = vpop.xlane.xlu0 %504 }
 0x6b6   :  { %1836 = vrcp.f32 %v505_v61 }
 0x6b7   :  { %v514_v62 = vpack.c.bf16 %v512_v60, %v512_v60 }
 0x6b9   :  { %v516_v3 = vpop.permute.xlu0 %515  ;;  %1706 = vmatmul.mubr.msk.bf16.vlgmr.msra.gmra.mrb[4].mxu0 %vm172_vm2, %v514_v62 }
 0x6ba   :  { %v521_v4 = vsel %vm297_vm3, %v516_v3, 0  ;;  %1716 = vmatpush3.bf16.msra.mxu0 %v665_v63  ;;  %1717 = vmatprep.mubr.msk.bf16.mxu0 %vm1883_vm1, %v1882_v15 }
 0x6bb   :  { %1698 = vmatpush3.bf16.msra.mxu1 %v521_v4  ;;  %1727 = vmatprep.subr.bf16.mxu0 %v1882_v15 }
 0x6bc   :  { %1709 = vmatprep.subr.bf16.mxu1 %v1882_v15 }
 0x6bd   :  { %v709_v33 = vpop.permute.xlu0 %708 }
 0x6c0   :  { %v1837_v6 = vpop.eup %1836 }
 0x6c1   :  { %v511_v7 = vmul.f32 %v1837_v6, %v1833_v55  ;;  %1718 = vmatmul.mubr.msk.bf16.vlgmr.msra.gmra.mrb[8].mxu0 %vm172_vm2, %v389_v34 }
 0x6c2   :  { %1729 = vmatprep.mubr.msk.bf16.mxu0 %vm1883_vm1, %v1882_v15 }
 0x6c3   :  { %1728 = vmatpush3.bf16.xpose.msra.mxu0 %v766_v8  ;;  %v513_v9 = vpack.c.bf16 %v511_v7, %v511_v7 }
 0x6c4   :  { %1739 = vmatprep.subr.bf16.mxu0 %v1882_v15 }
 0x6c5   :  { %1700 = vmatmul.mubr.msk.bf16.vlgmr.msra.gmra.mrb[24].mxu1 %vm172_vm2, %v513_v9 }
 0x6c6   :  { %1711 = vmatprep.mubr.msk.bf16.mxu1 %vm1883_vm1, %v1882_v15  ;;  %1710 = vmatpush3.bf16.msra.mxu1 %v618_v12 }
 0x6c7   :  { %1721 = vmatprep.subr.bf16.mxu1 %v1882_v15 }
 0x6ca   :  { %1730 = vmatmul.mubr.msk.bf16.vlgmr.msra.gmra.mrb[12].mxu0 %vm172_vm2, %v759_v10 }
 0x6cb   :  { %1741 = vmatprep.mubr.msk.bf16.mxu0 %vm1883_vm1, %v1882_v15 }
 0x78c   :  { %v605_v13 = vpop.f32.mrb[4].mxu0 }
 0x78d   :  { %v1707_v14 = vpop.f32.mrb[5].mxu0 }
 0x78e   :  { %v608_v16 = vpop.f32.mrb[6].mxu0  ;;  %v1580_v14 = vld [vmem:[%s2265_s5 + $0x8] sm:$0xf] }
 0x78f   :  { %v1708_v17 = vpop.f32.mrb[7].mxu0  ;;  %v935_v16 = vsel %vm297_vm3, %v1580_v14, 0 }
 0x794   :  { %v701_v18 = vpop.f32.mrb[8].mxu0 }
 0x795   :  { %v1719_v19 = vpop.f32.mrb[9].mxu0 }
 0x796   :  { %v704_v20 = vpop.f32.mrb[10].mxu0 }
 0x797   :  { %v1720_v21 = vpop.f32.mrb[11].mxu0 }
 0x798   :  { %v557_v22 = vpop.f32.mrb[24].mxu1 }
 0x799   :  { %v611_v23 = vpack.c.bf16 %v605_v13, %v557_v22  ;;  %v1701_v24 = vpop.f32.mrb[25].mxu1 }
 0x79a   :  { %v560_v25 = vpop.f32.mrb[26].mxu1 }
 0x79b   :  { %v1702_v27 = vpop.f32.mrb[27].mxu1  ;;  %1712 = vmatmul.mubr.msk.bf16.vlgmr.msra.gmra.mrb[28].mxu1 %vm172_vm2, %v611_v23 }
 0x79c   :  { %1722 = vmatpush3.bf16.xpose.msra.mxu1 %v716_v26  ;;  %1723 = vmatprep.mubr.msk.bf16.mxu1 %vm1883_vm1, %v1882_v15 }
 0x79d   :  { %v802_v28 = vpop.f32.mrb[12].mxu0  ;;  %1733 = vmatprep.subr.bf16.mxu1 %v1882_v15 }
 0x79e   :  { %v1731_v29 = vpop.f32.mrb[13].mxu0  ;;  %v811_v30 = vsel %vm172_vm2, %v802_v28, -inf }
 0x79f   :  { %812 = vmax.xlane.f32.xlu1 %v811_v30  ;;  %v805_v31 = vpop.f32.mrb[14].mxu0 }
 0x7a0   :  { %v1732_v32 = vpop.f32.mrb[15].mxu0 }
 0x7a3   :  { %1724 = vmatmul.mubr.msk.bf16.vlgmr.msra.gmra.mrb[32].mxu1 %vm172_vm2, %v709_v33 }
 0x7a4   :  { %1735 = vmatprep.mubr.msk.bf16.mxu1 %vm1883_vm1, %v1882_v15 }
 0x7b0   :  { %880 = vrot.lane.b32.xlu1 %v2015_v42, %s1891_s28 }
 0x7b4   :  { %982 = vrot.lane.b32.xlu1 %v2013_v39, %s1892_s0 }
 0x7b8   :  { %1032 = vrot.lane.b32.xlu1 %v2015_v42, %s1892_s0 }
 0x7bc   :  { %1030 = vrot.lane.b32.xlu1 %v2015_v42, %s1893_s29 }
 0x82c   :  { %v813_v34 = vpop.xlane.xlu1 %812 }
 0x82d   :  { %v815_v37 = vsub.f32 %v802_v28, %v813_v34 }
 0x82f   :  { %v818_v38 = vmul.f32 1.442695, %v815_v37 }
 0x830   :  { %v881_v35 = vpop.permute.xlu1 %880 }
 0x831   :  { %v886_v36 = vsel %vm297_vm3, %v881_v35, 0  ;;  %1838 = vpow2.f32 %v818_v38 }
 0x832   :  { %1740 = vmatpush3.bf16.msra.mxu0 %v886_v36 }
 0x833   :  { %1751 = vmatprep.subr.bf16.mxu0 %v1882_v15 }
 0x834   :  { %v983_v62 = vpop.permute.xlu1 %982 }
 0x835   :  { %v988_v2 = vsel %vm172_vm2, %v983_v62, 0 }
 0x838   :  { %v1033_v22 = vpop.permute.xlu1 %1032 }
 0x839   :  { %v1038_v27 = vsel %vm172_vm2, %v1033_v22, 0 }
 0x83b   :  { %v1839_v50 = vpop.eup %1838 }
 0x83c   :  { %v823_v53 = vsel %vm172_vm2, %v1839_v50, 0.0  ;;  %v1031_v29 = vpop.permute.xlu1 %1030 }
 0x86e   :  { %v654_v40 = vpop.f32.mrb[28].mxu1 }
 0x86f   :  { %v2119_v41 = vadd.f32 %v701_v18, %v654_v40  ;;  %v1713_v43 = vpop.f32.mrb[29].mxu1 }
 0x870   :  { %v657_v44 = vpop.f32.mrb[30].mxu1 }
 0x871   :  { %v2121_v45 = vadd.f32 %v704_v20, %v657_v44  ;;  %v1714_v46 = vpop.f32.mrb[31].mxu1 }
 0x876   :  { %v752_v47 = vpop.f32.mrb[32].mxu1 }
 0x877   :  { %v1725_v48 = vpop.f32.mrb[33].mxu1  ;;  %v808_v49 = vsel %vm172_vm2, %v752_v47, -inf }
 0x878   :  { %809 = vmax.xlane.f32.xlu0 %v808_v49  ;;  %v755_v51 = vpop.f32.mrb[34].mxu1 }
 0x879   :  { %v1726_v52 = vpop.f32.mrb[35].mxu1 }
 0x87c   :  { %824 = vadd.xlane.f32.xlu0 %v823_v53 }
 0x905   :  { %v810_v54 = vpop.xlane.xlu0 %809 }
 0x906   :  { %v814_v55 = vsub.f32 %v752_v47, %v810_v54 }
 0x908   :  { %v816_v56 = vmul.f32 1.442695, %v814_v55 }
 0x909   :  { %v825_v57 = vpop.xlane.xlu0 %824 }
 0x90a   :  { %1840 = vpow2.f32 %v816_v56 }
 0x90b   :  { %1842 = vrcp.f32 %v825_v57 }
 0x914   :  { %v1841_v58 = vpop.eup %1840 }
 0x915   :  { %v1843_v59 = vpop.eup %1842  ;;  %v820_v60 = vsel %vm172_vm2, %v1841_v58, 0.0 }
 0x916   :  { %v829_v61 = vmul.f32 %v1843_v59, %v1839_v50  ;;  %821 = vadd.xlane.f32.xlu0 %v820_v60 }
 0x918   :  { %v831_v63 = vpack.c.bf16 %v829_v61, %v829_v61 }
 0x91a   :  { %1742 = vmatmul.mubr.msk.bf16.vlgmr.msra.gmra.mrb[16].mxu0 %vm172_vm2, %v831_v63  ;;  %v1586_v63 = vld [vmem:[%s2265_s5 + $0xc] sm:$0xf] }
 0x91b   :  { %1752 = vmatpush3.bf16.xpose.msra.mxu0 %v988_v2  ;;  %1753 = vmatprep.mubr.msk.bf16.mxu0 %vm1883_vm1, %v1882_v15  ;;  %v1207_v2 = vsel %vm297_vm3, %v1586_v63, 0 }
 0x91c   :  { %1763 = vmatprep.subr.bf16.mxu0 %v1882_v15 }
 0x92c   :  { %832 = vrot.lane.b32.xlu0 %v2013_v39, %s1891_s28 }
 0x930   :  { %980 = vrot.lane.b32.xlu0 %v2013_v39, %s1893_s29 }
 0x9a3   :  { %v822_v3 = vpop.xlane.xlu0 %821 }
 0x9a4   :  { %1844 = vrcp.f32 %v822_v3 }
 0x9a7   :  { %v833_v4 = vpop.permute.xlu0 %832 }
 0x9a8   :  { %v838_v5 = vsel %vm297_vm3, %v833_v4, 0 }
 0x9a9   :  { %1734 = vmatpush3.bf16.msra.mxu1 %v838_v5 }
 0x9aa   :  { %1745 = vmatprep.subr.bf16.mxu1 %v1882_v15 }
 0x9ab   :  { %v981_v6 = vpop.permute.xlu0 %980 }
 0x9ac   :  { %1754 = vmatmul.mubr.msk.bf16.vlgmr.msra.gmra.mrb[20].mxu0 %vm172_vm2, %v981_v6 }
 0x9ad   :  { %1765 = vmatprep.mubr.msk.bf16.mxu0 %vm1883_vm1, %v1882_v15 }
 0x9ae   :  { %v1845_v7 = vpop.eup %1844 }
 0x9af   :  { %v828_v8 = vmul.f32 %v1845_v7, %v1841_v58 }
 0x9b1   :  { %v830_v9 = vpack.c.bf16 %v828_v8, %v828_v8 }
 0x9b3   :  { %1736 = vmatmul.mubr.msk.bf16.vlgmr.msra.gmra.mrb[36].mxu1 %vm172_vm2, %v830_v9 }
 0x9b4   :  { %1747 = vmatprep.mubr.msk.bf16.mxu1 %vm1883_vm1, %v1882_v15  ;;  %1746 = vmatpush3.bf16.msra.mxu1 %v935_v16 }
 0x9b5   :  { %1757 = vmatprep.subr.bf16.mxu1 %v1882_v15 }
 0x9ed   :  { %v922_v10 = vpop.f32.mrb[16].mxu0 }
 0x9ee   :  { %v1743_v11 = vpop.f32.mrb[17].mxu0 }
 0x9ef   :  { %v925_v12 = vpop.f32.mrb[18].mxu0  ;;  %v1588_v11 = vld [vmem:[%s2266_s6] ss:$0 sm:$0xff] }
 0x9f0   :  { %v1744_v13 = vpop.f32.mrb[19].mxu0 }
 0xa7f   :  { %v1024_v17 = vpop.f32.mrb[20].mxu0 }
 0xa80   :  { %v1755_v18 = vpop.f32.mrb[21].mxu0  ;;  %v1080_v19 = vsel %vm172_vm2, %v1024_v17, -inf }
 0xa81   :  { %1081 = vmax.xlane.f32.xlu0 %v1080_v19  ;;  %v1027_v20 = vpop.f32.mrb[22].mxu0 }
 0xa82   :  { %v1756_v21 = vpop.f32.mrb[23].mxu0 }
 0xa86   :  { %v874_v23 = vpop.f32.mrb[36].mxu1 }
 0xa87   :  { %v928_v24 = vpack.c.bf16 %v922_v10, %v874_v23  ;;  %v1737_v25 = vpop.f32.mrb[37].mxu1 }
 0xa88   :  { %v877_v26 = vpop.f32.mrb[38].mxu1 }
 0xa89   :  { %v1738_v28 = vpop.f32.mrb[39].mxu1  ;;  %1748 = vmatmul.mubr.msk.bf16.vlgmr.msra.gmra.mrb[40].mxu1 %vm172_vm2, %v928_v24 }
 0xa8a   :  { %1758 = vmatpush3.bf16.xpose.msra.mxu1 %v1038_v27  ;;  %1759 = vmatprep.mubr.msk.bf16.mxu1 %vm1883_vm1, %v1882_v15 }
 0xa8b   :  { %1769 = vmatprep.subr.bf16.mxu1 %v1882_v15 }
 0xa91   :  { %1760 = vmatmul.mubr.msk.bf16.vlgmr.msra.gmra.mrb[44].mxu1 %vm172_vm2, %v1031_v29 }
 0xa92   :  { %1771 = vmatprep.mubr.msk.bf16.mxu1 %vm1883_vm1, %v1882_v15 }
 0xb0e   :  { %v1082_v30 = vpop.xlane.xlu0 %1081 }
 0xb0f   :  { %v1086_v31 = vsub.f32 %v1024_v17, %v1082_v30 }
 0xb11   :  { %v1088_v32 = vmul.f32 1.442695, %v1086_v31 }
 0xb13   :  { %1846 = vpow2.f32 %v1088_v32 }
 0xb1d   :  { %v1847_v33 = vpop.eup %1846 }
 0xb1e   :  { %v1092_v34 = vsel %vm172_vm2, %v1847_v33, 0.0 }
 0xb1f   :  { %1093 = vadd.xlane.f32.xlu0 %v1092_v34  ;;  %v1800_v34 = vld [vmem:[%s2269_s9] ss:$8 sps:$4 sm:$0xff]  }
 0xb5c   :  { %v971_v35 = vpop.f32.mrb[40].mxu1 }
 0xb5d   :  { %v978_v36 = vadd.f32 %v971_v35, %v2119_v41  ;;  %v1749_v37 = vpop.f32.mrb[41].mxu1  ;;  %v1805_v35 = vld [vmem:[%s2269_s9 + $0x14] ss:$8 sps:$4 sm:$0xff]  }
 0xb5e   :  { %v974_v38 = vpop.f32.mrb[42].mxu1  ;;  %v1895_v37 = vmov 0  }
 0xb5f   :  { %v979_v40 = vadd.f32 %v974_v38, %v2121_v45  ;;  %v1750_v43 = vpop.f32.mrb[43].mxu1  ;;  %v1806_v38 = vld [vmem:[%s2271_s11] sm:$0xff]  }
 0xb60   :  { %v1808_v43 = vld [vmem:[%s2271_s11 + $0x10] sm:$0xff]  }
 0xb64   :  { %v1074_v44 = vpop.f32.mrb[44].mxu1 }
 0xb65   :  { %v1761_v46 = vpop.f32.mrb[45].mxu1  ;;  %v1083_v47 = vsel %vm172_vm2, %v1074_v44, -inf }
 0xb66   :  { %1084 = vmax.xlane.f32.xlu1 %v1083_v47  ;;  %v1077_v48 = vpop.f32.mrb[46].mxu1  ;;  %v1810_v46 = vld [vmem:[%s2271_s11 + $0x20] sm:$0xff]   ;;  %v1811_v47 = vld [vmem:[%s2271_s11 + $0x28] sm:$0xff]  }
 0xb67   :  { %v1762_v49 = vpop.f32.mrb[47].mxu1  ;;  %v1812_v48 = vld [vmem:[%s2271_s11 + $0x30] sm:$0xff]  }
 0xb68   :  { %v1813_v49 = vld [vmem:[%s2271_s11 + $0x38] sm:$0xff]  }
 0xb77   :  { %1152 = vrot.lane.b32.xlu1 %v2015_v42, %s1894_s3 }
 0xbac   :  { %v1094_v55 = vpop.xlane.xlu0 %1093 }
 0xbf3   :  { %v1085_v50 = vpop.xlane.xlu1 %1084 }
 0xbf4   :  { %v1087_v51 = vsub.f32 %v1074_v44, %v1085_v50  ;;  %v1809_v44 = vld [vmem:[%s2271_s11 + $0x18] sm:$0xff]   ;;  %v1814_v50 = vld [vmem:[%s2271_s11 + $0x40] sm:$0xff]  }
 0xbf6   :  { %v1090_v52 = vmul.f32 1.442695, %v1087_v51 }
 0xbf7   :  { %v1153_v53 = vpop.permute.xlu1 %1152 }
 0xbf8   :  { %1848 = vpow2.f32 %v1090_v52  ;;  %v1158_v41 = vsel %vm297_vm3, %v1153_v53, 0 }
 0xbf9   :  { %1770 = vmatpush3.bf16.msra.mxu1 %v1158_v41  ;;  %1850 = vrcp.f32 %v1094_v55 }
 0xc02   :  { %v1849_v45 = vpop.eup %1848 }
 0xc03   :  { %v1095_v54 = vsel %vm172_vm2, %v1849_v45, 0.0  ;;  %v1851_v56 = vpop.eup %1850 }
 0xc04   :  { %1096 = vadd.xlane.f32.xlu0 %v1095_v54  ;;  %v1100_v42 = vmul.f32 %v1851_v56, %v1847_v33  ;;  %v1589_v56 = vld [vmem:[%s2267_s7] ss:$0 sm:$0xff] }
 0xc06   :  { %v1102_v60 = vpack.c.bf16 %v1100_v42, %v1100_v42 }
 0xc1a   :  { %1104 = vrot.lane.b32.xlu0 %v2013_v39, %s1894_s3 }
 0xc91   :  { %v1097_v57 = vpop.xlane.xlu0 %1096 }
 0xc92   :  { %1852 = vrcp.f32 %v1097_v57 }
 0xc95   :  { %v1105_v58 = vpop.permute.xlu0 %1104 }
 0xc96   :  { %v1110_v59 = vsel %vm297_vm3, %v1105_v58, 0 }
 0xc97   :  { %1764 = vmatpush3.bf16.msra.mxu0 %v1110_v59 }
 0xc98   :  { %1775 = vmatprep.subr.bf16.mxu0 %v1882_v15 }
 0xc9a   :  { %1766 = vmatmul.mubr.msk.bf16.vlgmr.msra.gmra.mrb[24].mxu0 %vm172_vm2, %v1102_v60  ;;  %v1590_v60 = vld [vmem:[%s2268_s8] ss:$0 sm:$0xff] }
 0xc9b   :  { %1777 = vmatprep.mubr.msk.bf16.mxu0 %vm1883_vm1, %v1882_v15  ;;  %1776 = vmatpush3.bf16.msra.mxu0 %v1207_v2  ;;  %v1815_v2 = vld [vmem:[%s2271_s11 + $0x48] sm:$0xff]  }
 0xc9c   :  { %v1853_v61 = vpop.eup %1852  ;;  %1498 = vmatprep.subr.bf16.mxu0 %v1895_v37 }
 0xc9d   :  { %v1101_v39 = vmul.f32 %v1853_v61, %v1849_v45 }
 0xc9f   :  { %v1103_v62 = vpack.c.bf16 %v1101_v39, %v1101_v39 }
 0xca1   :  { %1772 = vmatmul.mubr.msk.bf16.vlgmr.msra.gmra.mrb[48].mxu1 %vm172_vm2, %v1103_v62 }
 0xca2   :  { %1375 = vmatprep.mubr.bf16.mxu1 %v1895_v37 }
 0xd6d   :  { %v1146_v3 = vpop.f32.mrb[24].mxu0 }
 0xd6e   :  { %v1767_v4 = vpop.f32.mrb[25].mxu0 }
 0xd6f   :  { %v1149_v5 = vpop.f32.mrb[26].mxu0  ;;  %v1817_v4 = vld [vmem:[%s2271_s11 + $0x58] sm:$0xff]  }
 0xd70   :  { %v1768_v6 = vpop.f32.mrb[27].mxu0  ;;  %v1310_v5 = vlaneseq }
 0xd72   :  { %v1311_v6 = vshrl.u32 %v1310_v5, 7 }
 0xd74   :  { %v1194_v7 = vpop.f32.mrb[48].mxu1 }
 0xd75   :  { %v1200_v8 = vpack.c.bf16 %v1194_v7, %v1146_v3  ;;  %v1773_v9 = vpop.f32.mrb[49].mxu1  ;;  %v1816_v3 = vld [vmem:[%s2271_s11 + $0x50] sm:$0xff]   ;;  %v1312_v7 = vsub.s32 0, %v1311_v6 }
 0xd76   :  { %v1197_v15 = vpop.f32.mrb[50].mxu1  ;;  %v1316_v9 = vsub.s32 1, %v1311_v6 }
 0xd77   :  { %v1774_v10 = vpop.f32.mrb[51].mxu1  ;;  %1778 = vmatmul.mubr.msk.bf16.vlgmr.msra.gmra.mrb[28].mxu0 %vm172_vm2, %v1200_v8  ;;  %v52_v8 = vld [vmem:[%s2270_s10] sm:$0x3] }
 0xd78   :  { %1499 = vmatpush1.bf16.msra.mxu0 %v1806_v38  ;;  %v1313_v15 = vrot.slane %v52_v8, %v1312_v7  ;;  %v1317_v10 = vrot.slane %v52_v8, %v1316_v9 }
 0xd79   :  { %1500 = vmatprep.subr.bf16.mxu0 %v1895_v37 }
 0xe4a   :  { %v1243_v12 = vpop.f32.mrb[28].mxu0 }
 0xe4b   :  { %v1250_v13 = vadd.f32 %v1243_v12, %v978_v36  ;;  %v1779_v14 = vpop.f32.mrb[29].mxu0  ;;  %v1803_v36 = vld [vmem:[%s2269_s9 + $0x10] ss:$8 sps:$4 sm:$0xff]  }
 0xe4c   :  { %v1246_v16 = vpop.f32.mrb[30].mxu0 }
 0xe4d   :  { %v1258_v17 = vadd.f32 %v1588_v11, %v1250_v13  ;;  %v1251_v18 = vadd.f32 %v1246_v16, %v979_v40  ;;  %v1780_v19 = vpop.f32.mrb[31].mxu0  ;;  %v1807_v40 = vld [vmem:[%s2271_s11 + $0x8] sm:$0xff]  }
 0xe4e   :  { %1501 = vmatpush1.bf16.msra.mxu0 %v1807_v40 }
 0xe4f   :  { %v1259_v20 = vadd.f32 %v1588_v11, %v1251_v18  ;;  %v1260_v21 = vadd.f32 %v1258_v17, %v1972_v0  ;;  %1502 = vmatprep.subr.bf16.mxu0 %v1895_v37 }
 0xe51   :  { %v1262_v22 = vsel %vm56_vm0, %v1260_v21, 0.0  ;;  %v1261_v23 = vadd.f32 %v1259_v20, %v1977_v1  ;;  %v1802_v1 = vld [vmem:[%s2269_s9 + $0x4] ss:$8 sps:$4 sm:$0xff]  }
 0xe52   :  { %1263 = vadd.xlane.f32.xlu1 %v1262_v22  ;;  %1343 = vmatprep.subr.bf16.mxu1 %v1802_v1 }
 0xe53   :  { %v1265_v24 = vsel %vm56_vm0, %v1261_v23, 0.0  ;;  %1344 = vmatpush1.bf16.msra.mxu1 %v1800_v34  ;;  %1503 = vmatpush1.bf16.msra.mxu0 %v1808_v43 }
 0xe54   :  { %1266 = vadd.xlane.f32.xlu0 %v1265_v24  ;;  %1345 = vmatprep.subr.bf16.mxu1 %v1805_v35 }
 0xe55   :  { %1504 = vmatprep.subr.bf16.mxu0 %v1895_v37 }
 0xe57   :  { %1346 = vmatpush1.bf16.msra.mxu1 %v1803_v36  ;;  %1505 = vmatpush1.bf16.msra.mxu0 %v1809_v44 }
 0xe58   :  { %1506 = vmatprep.subr.bf16.mxu0 %v1895_v37 }
 0xe5b   :  { %1507 = vmatpush1.bf16.msra.mxu0 %v1810_v46 }
 0xe5c   :  { %1508 = vmatprep.subr.bf16.mxu0 %v1895_v37 }
 0xe5f   :  { %1509 = vmatpush1.bf16.msra.mxu0 %v1811_v47 }
 0xe60   :  { %1510 = vmatprep.subr.bf16.mxu0 %v1895_v37 }
 0xe63   :  { %1511 = vmatpush1.bf16.msra.mxu0 %v1812_v48 }
 0xe64   :  { %1512 = vmatprep.subr.bf16.mxu0 %v1895_v37 }
 0xe67   :  { %1513 = vmatpush1.bf16.msra.mxu0 %v1813_v49 }
 0xe68   :  { %1514 = vmatprep.subr.bf16.mxu0 %v1895_v37 }
 0xe6b   :  { %1515 = vmatpush1.bf16.msra.mxu0 %v1814_v50 }
 0xe6c   :  { %1516 = vmatprep.subr.bf16.mxu0 %v1895_v37 }
 0xe6f   :  { %1517 = vmatpush1.bf16.msra.mxu0 %v1815_v2 }
 0xe70   :  { %1518 = vmatprep.subr.bf16.mxu0 %v1895_v37 }
 0xe73   :  { %1519 = vmatpush1.bf16.msra.mxu0 %v1816_v3 }
 0xe74   :  { %1520 = vmatprep.subr.bf16.mxu0 %v1895_v37 }
 0xe77   :  { %1521 = vmatpush1.bf16.msra.mxu0 %v1817_v4 }
 0xedf   :  { %v1264_v25 = vpop.xlane.xlu1 %1263 }
 0xee0   :  { %v1268_v26 = vmul.f32 0.03125, %v1264_v25 }
 0xee1   :  { %v1267_v27 = vpop.xlane.xlu0 %1266 }
 0xee2   :  { %v1270_v28 = vsub.f32 %v1260_v21, %v1268_v26  ;;  %v1269_v29 = vmul.f32 0.03125, %v1267_v27  ;;  %v1596_v26 = vld [vmem:[%s2272_s12] ss:$0 sm:$0xff] }
 0xee4   :  { %v1271_v30 = vsub.f32 %v1261_v23, %v1269_v29  ;;  %v1272_v31 = vmul.f32 %v1270_v28, %v1270_v28 }
 0xee6   :  { %v1274_v32 = vsel %vm56_vm0, %v1272_v31, 0.0  ;;  %v1273_v33 = vmul.f32 %v1271_v30, %v1271_v30 }
 0xee7   :  { %1275 = vadd.xlane.f32.xlu0 %v1274_v32 }
 0xee8   :  { %v1277_v0 = vsel %vm56_vm0, %v1273_v33, 0.0 }
 0xee9   :  { %1278 = vadd.xlane.f32.xlu1 %v1277_v0 }
 0xf74   :  { %v1276_v51 = vpop.xlane.xlu0 %1275 }
 0xf75   :  { %v1280_v52 = vmul.f32 0.03125, %v1276_v51 }
 0xf76   :  { %v1279_v53 = vpop.xlane.xlu1 %1278 }
 0xf77   :  { %v1282_v41 = vadd.f32 1e-05, %v1280_v52  ;;  %v1281_v45 = vmul.f32 0.03125, %v1279_v53 }
 0xf79   :  { %1854 = vrsqrt.f32 %v1282_v41  ;;  %v1283_v54 = vadd.f32 1e-05, %v1281_v45 }
 0xf7b   :  { %1856 = vrsqrt.f32 %v1283_v54 }
 0xf83   :  { %v1855_v55 = vpop.eup %1854 }
 0xf84   :  { %v1286_v57 = vmul.f32 %v1855_v55, %v1270_v28 }
 0xf85   :  { %v1857_v42 = vpop.eup %1856 }
 0xf86   :  { %v1294_v58 = vmul.f32 %v1589_v56, %v1286_v57  ;;  %v1287_v59 = vmul.f32 %v1857_v42, %v1271_v30 }
 0xf88   :  { %v1295_v61 = vmul.f32 %v1589_v56, %v1287_v59  ;;  %v1302_v39 = vadd.f32 %v1590_v60, %v1294_v58 }
 0xf8a   :  { %v1303_v62 = vadd.f32 %v1590_v60, %v1295_v61 }
 0xf8c   :  { %v1304_v63 = vpack.c.bf16 %v1303_v62, %v1302_v39 }
 0xf8e   :  { %1595 = vmatmul.mubr.msk.bf16.vlgmr.msra.gmra.mrb[52].mxu1 %vm56_vm0, %v1304_v63 }
0x1061   :  { %v1377_v11 = vpop.f32.mrb[52].mxu1 }
0x1062   :  { %v1378_v12 = vadd.f32 %v1377_v11, %v1313_v15  ;;  %v1379_v13 = vpop.f32.mrb[53].mxu1 }
0x1063   :  { %v1380_v14 = vadd.f32 %v1379_v13, %v1317_v10  ;;  %v1381_v16 = vpop.f32.mrb[54].mxu1 }
0x1064   :  { %v1382_v17 = vadd.f32 %v1381_v16, %v1313_v15  ;;  %v1383_v18 = vpop.f32.mrb[55].mxu1  ;;  %v1386_v20 = vmax.f32 %v1378_v12, 0.0 }
0x1065   :  { %v1384_v19 = vadd.f32 %v1383_v18, %v1317_v10  ;;  %v1387_v22 = vmax.f32 %v1380_v14, 0.0 }
0x1066   :  { %v1388_v21 = vmax.f32 %v1382_v17, 0.0 }
0x1067   :  { %v1389_v23 = vmax.f32 %v1384_v19, 0.0 }
0x1068   :  { %v1390_v24 = vpack.c.bf16 %v1388_v21, %v1386_v20 }
0x1069   :  { %v1391_v25 = vpack.c.bf16 %v1389_v23, %v1387_v22 }
0x106b   :  { %1609 = vmatprep.mubr.msk.bf16.mxu0 %vm1494_vm4, %v1391_v25 }
0x106c   :  { %1531 = vmatmul.mubr.bf16.vlgmr.msra.gmra.mrb[32].mxu0 %v1390_v24 }
0x113f   :  { %v1532_v27 = vpop.f32.mrb[32].mxu0 }
0x1140   :  { %v1533_v28 = vadd.f32 %v1596_v26, %v1532_v27  ;;  %v1534_v29 = vpop.f32.mrb[33].mxu0 }
0x1141   :  { %v1535_v30 = vpop.f32.mrb[34].mxu0 }
0x1142   :  { %v1539_v31 = vadd.f32 %v1533_v28, %v1302_v39  ;;  %v1536_v32 = vadd.f32 %v1596_v26, %v1535_v30  ;;  %v1537_v33 = vpop.f32.mrb[35].mxu0 }
0x1144   :  { %1541 = vst.msk [vmem:[#allocation2] sm:$0xff] %vm56_vm0, %v1539_v31  ;;  %v1540_v0 = vadd.f32 %v1536_v32, %v1303_v62 }
0x1146   :  { %1542 = vst.msk [vmem:[#allocation2 + $0x8] sm:$0xff] %vm56_vm0, %v1540_v0 }
0x1147   :  { %1869 = shalt.err (!%p1866_p4)
}
0x1148   :  { %s1870_s28 = scalar_lea.hbm %s2273_s13, 256 }
0x1149   :  { %p1871_p5 = scmp.ne.s32.totalorder %s2273_s13, %s1870_s28  ;;  %p1874_p6 = scmp.lt.u32.totalorder %s1870_s28, %s2273_s13 }
0x114b   :  { %p1876_p7 = pnand %p1874_p6, %p1871_p5 }
0x114d   :  { %1879 = shalt.err (!%p1876_p7)
}
0x114e   :  { %s1897_s3 = smov 128   ;;  %s1898_s15 = smov 8  }
0x114f   :  { %1554 = dma.vmem_to_hbm [thread:$0]  %s1549_s26, 256, %s2273_s13, [#allocation3], %s1897_s3, %s1897_s3, %s1898_s15  }
0x1150   :  { %1880 = dma.done.wait [#allocation3], 256  }
0x1151   :  { %1881 = vsyncadd [#allocation3], 4294967040 }
0x1152   :  { %1558 = vsyncpa [#allocation3], 1 }

</bundles_post_ra>
